<compile_context>
chip_gen: v5e
topology: v5e:2x2
jax: 0.10.0
libtpu: 0.0.40
codegen_flags: <defaults>
</compile_context>

<pallas_src>
import jax
import jax.numpy as jnp
from jax import lax
from jax.experimental import pallas as pl
from jax.experimental.pallas import tpu as pltpu


# ----------------------------- Pallas kernels ------------------------------

def conv_relu_pool_kernel(p_ref, w_ref, b_ref, o_ref):
    """Fused conv (matmul over pre-grouped patches) + bias + ReLU + 2x2 maxpool.

    p_ref : (4, R, K) patch rows grouped by pool-window offset (dy, dx);
            group g = dy*2+dx holds conv-output pixels (2i+dy, 2j+dx).
    w_ref : (K, C)    conv weights in (kh, kw, cin) x cout order.
    b_ref : (1, C)
    o_ref : (R, C)    pooled feature map, rows in (i, j) order, channels last.
    """
    w = w_ref[...]
    acc = jnp.dot(p_ref[0], w, preferred_element_type=jnp.float32)
    for g in range(1, 4):
        acc = jnp.maximum(
            acc, jnp.dot(p_ref[g], w, preferred_element_type=jnp.float32))
    # maxpool commutes with the (constant) bias add and with ReLU.
    o_ref[...] = jnp.maximum(acc + b_ref[...], 0.0)


def fc_head_kernel(x_ref, w1_ref, b1_ref, w2_ref, b2_ref, w3_ref, b3_ref, o_ref):
    """Fused fc1+ReLU -> fc2+ReLU -> fc3 -> softmax (row-wise)."""
    h = jnp.dot(x_ref[...], w1_ref[...], preferred_element_type=jnp.float32)
    h = jnp.maximum(h + b1_ref[...], 0.0)
    h = jnp.dot(h, w2_ref[...], preferred_element_type=jnp.float32)
    h = jnp.maximum(h + b2_ref[...], 0.0)
    y = jnp.dot(h, w3_ref[...], preferred_element_type=jnp.float32) + b3_ref[...]
    y = y - jnp.max(y, axis=1, keepdims=True)
    e = jnp.exp(y)
    inv = pl.reciprocal(jnp.sum(e, axis=1, keepdims=True), approx=False)
    o_ref[...] = e * inv


# ------------------------------ Pallas wrappers -----------------------------

def conv_relu_pool(patches, w, b):
    """patches: (B, 4, R, K) -> pooled (B, R, C)."""
    B, G, R, K = patches.shape
    Kw, C = w.shape
    assert G == 4 and Kw == K
    return pl.pallas_call(
        conv_relu_pool_kernel,
        grid=(B,),
        in_specs=[
            pl.BlockSpec((None, G, R, K), lambda i: (i, 0, 0, 0)),
            pl.BlockSpec((K, C), lambda i: (0, 0)),
            pl.BlockSpec((1, C), lambda i: (0, 0)),
        ],
        out_specs=pl.BlockSpec((None, R, C), lambda i: (i, 0, 0)),
        out_shape=jax.ShapeDtypeStruct((B, R, C), jnp.float32),
        compiler_params=pltpu.CompilerParams(dimension_semantics=("parallel",)),
    )(patches, w, b)


def fc_head(x, w1, b1, w2, b2, w3, b3):
    """x: (B, 400) -> softmax probabilities (B, n_class)."""
    B, D = x.shape
    N = w3.shape[1]
    tb = B if B <= 128 else 128           # batch tile (multiple of 8 when tiling)
    grid = (pl.cdiv(B, tb),)

    def full(shape):
        return pl.BlockSpec(shape, lambda i, _n=len(shape): (0,) * _n)

    return pl.pallas_call(
        fc_head_kernel,
        grid=grid,
        in_specs=[pl.BlockSpec((tb, D), lambda i: (i, 0)),
                  full(w1.shape), full(b1.shape),
                  full(w2.shape), full(b2.shape),
                  full(w3.shape), full(b3.shape)],
        out_specs=pl.BlockSpec((tb, N), lambda i: (i, 0)),
        out_shape=jax.ShapeDtypeStruct((B, N), jnp.float32),
        compiler_params=pltpu.CompilerParams(dimension_semantics=("parallel",)),
    )(x, w1, b1, w2, b2, w3, b3)


# --------------------------- host-side patch glue ---------------------------

def _pool_grouped_patches(x_nhwc, ksize):
    """im2col patches grouped by 2x2 pool-window offset.

    Returns (B, 4, OHp*OWp, ksize*ksize*C).  Group g = dy*2+dx contains the
    patch rows of conv-output pixels (2i+dy, 2j+dx); column order is
    (kh, kw, cin), matching the pre-permuted conv weights.
    """
    B, H, W, C = x_nhwc.shape
    OH, OW = H - ksize + 1, W - ksize + 1
    OHp, OWp = OH // 2, OW // 2
    cols = []
    for ki in range(ksize):
        for kj in range(ksize):
            cols.append(x_nhwc[:, ki:ki + OH, kj:kj + OW, :])
    p = jnp.concatenate(cols, axis=-1)                     # (B, OH, OW, k*k*C)
    groups = []
    for dy in range(2):
        for dx in range(2):
            g = p[:, dy::2, dx::2, :]                      # (B, OHp, OWp, K)
            groups.append(g.reshape(B, OHp * OWp, ksize * ksize * C))
    return jnp.stack(groups, axis=1)                       # (B, 4, R, K)


# ------------------------------ LeNet-5 forward -----------------------------

def prepare_params(params):
    """One-time weight preprocessing (hoisted out of the forward pass)."""
    def conv_w(w):  # torch (out, in, kh, kw) -> ((kh, kw, in), out)
        o, i, kh, kw = w.shape
        return jnp.transpose(w, (2, 3, 1, 0)).reshape(kh * kw * i, o)

    # fc1 columns are in torch NCHW-flatten order (c, h, w); permute them to
    # (h, w, c) so the pooled conv2 output can be fed without any transpose.
    fc1 = params["fc1_w"].reshape(-1, 16, 5, 5)            # (120, c, h, w)
    fc1 = jnp.transpose(fc1, (2, 3, 1, 0)).reshape(400, -1)

    return {
        "w1": conv_w(params["conv1_w"]), "b1": params["conv1_b"].reshape(1, -1),
        "w2": conv_w(params["conv2_w"]), "b2": params["conv2_b"].reshape(1, -1),
        "fc1_w": fc1,                    "fc1_b": params["fc1_b"].reshape(1, -1),
        "fc2_w": params["fc2_w"].T,      "fc2_b": params["fc2_b"].reshape(1, -1),
        "fc3_w": params["fc3_w"].T,      "fc3_b": params["fc3_b"].reshape(1, -1),
    }


def lenet5_forward(x_nchw, p):
    x = jnp.transpose(x_nchw, (0, 2, 3, 1))                # NCHW -> NHWC
    B = x.shape[0]

    # conv1 (3->6, k=5) + ReLU + maxpool 2x2, fused in one kernel.
    pat1 = _pool_grouped_patches(x, 5)                     # (B, 4, 196, 75)
    y1 = conv_relu_pool(pat1, p["w1"], p["b1"])            # (B, 196, 6) == (B,14,14,6)

    # conv2 (6->16, k=5) + ReLU + maxpool 2x2, fused in one kernel.
    pat2 = _pool_grouped_patches(y1.reshape(B, 14, 14, 6), 5)   # (B, 4, 25, 150)
    y2 = conv_relu_pool(pat2, p["w2"], p["b2"])            # (B, 25, 16) == (B,5,5,16)

    # Flatten in (h, w, c) order; fc1 weights were pre-permuted to match the
    # torch NCHW flatten, so no per-forward transpose is needed.
    xf = y2.reshape(B, 400)

    # fc1+ReLU+fc2+ReLU+fc3+softmax fused in one kernel.
    return fc_head(xf, p["fc1_w"], p["fc1_b"], p["fc2_w"], p["fc2_b"],
                   p["fc3_w"], p["fc3_b"])


# --------------------------- reference (pure XLA) ----------------------------

def lenet5_reference(x_nchw, params):
    dn = ("NCHW", "OIHW", "NCHW")
    y = lax.conv_general_dilated(x_nchw, params["conv1_w"], (1, 1), "VALID",
                                 dimension_numbers=dn)
    y = jax.nn.relu(y + params["conv1_b"][None, :, None, None])
    y = lax.reduce_window(y, -jnp.inf, lax.max, (1, 1, 2, 2), (1, 1, 2, 2), "VALID")
    y = lax.conv_general_dilated(y, params["conv2_w"], (1, 1), "VALID",
                                 dimension_numbers=dn)
    y = jax.nn.relu(y + params["conv2_b"][None, :, None, None])
    y = lax.reduce_window(y, -jnp.inf, lax.max, (1, 1, 2, 2), (1, 1, 2, 2), "VALID")
    y = y.reshape(y.shape[0], -1)                          # torch NCHW flatten
    y = jax.nn.relu(y @ params["fc1_w"].T + params["fc1_b"])
    y = jax.nn.relu(y @ params["fc2_w"].T + params["fc2_b"])
    y = y @ params["fc3_w"].T + params["fc3_b"]
    return jax.nn.softmax(y, axis=1)


# ------------------------------ parameter init ------------------------------

def init_params(key, n_class=10):
    ks = jax.random.split(key, 10)

    def u(k, shape, fan_in):
        bound = 1.0 / float(fan_in) ** 0.5
        return jax.random.uniform(k, shape, jnp.float32, -bound, bound)

    return {
        # torch layouts: conv weight (out, in, kh, kw); linear weight (out, in)
        "conv1_w": u(ks[0], (6, 3, 5, 5), 3 * 5 * 5),
        "conv1_b": u(ks[1], (6,), 3 * 5 * 5),
        "conv2_w": u(ks[2], (16, 6, 5, 5), 6 * 5 * 5),
        "conv2_b": u(ks[3], (16,), 6 * 5 * 5),
        "fc1_w": u(ks[4], (120, 400), 400),
        "fc1_b": u(ks[5], (120,), 400),
        "fc2_w": u(ks[6], (84, 120), 120),
        "fc2_b": u(ks[7], (84,), 120),
        "fc3_w": u(ks[8], (n_class, 84), 84),
        "fc3_b": u(ks[9], (n_class,), 84),
    }


if __name__ == "__main__":
    key = jax.random.PRNGKey(0)
    k_x, k_p = jax.random.split(key)
    # LeNet-5 requires 32x32 spatial input so the flatten hits 16*5*5 = 400.
    x = jax.random.normal(k_x, (2, 3, 32, 32), jnp.float32)
    params = init_params(k_p, n_class=10)
    prepped = prepare_params(params)          # one-time weight preprocessing

    out = jax.jit(lenet5_forward)(x, prepped)
    out = jax.block_until_ready(out)

    ref = jax.jit(lenet5_reference)(x, params)
    ref = jax.block_until_ready(ref)

    assert out.shape == (2, 10)
    assert jnp.allclose(jnp.sum(out, axis=1), 1.0, atol=1e-5)   # softmax rows
    assert jnp.allclose(out, ref, atol=1e-4)                    # matches PyTorch math
    print("KERNEL_OK")
</pallas_src>

<mosaic_0001>
module attributes {stable_mosaic.version = 11 : i64} {
  func.func @conv_relu_pool_kernel(%arg0: i32, %arg1: memref<1x4x196x75xf32, #tpu.memory_space<vmem>>, %arg2: memref<75x6xf32, #tpu.memory_space<vmem>>, %arg3: memref<1x6xf32, #tpu.memory_space<vmem>>, %arg4: memref<1x196x6xf32, #tpu.memory_space<vmem>>) attributes {dimension_semantics = [#tpu.dimension_semantics<parallel>], iteration_bounds = array<i64: 2>, scalar_prefetch = 0 : i64, scratch_operands = 0 : i64, tpu.core_type = #tpu.core_type<tc>, window_params = [{transform_indices = @transform_0, window_bounds = array<i64: 1, 4, 196, 75>}, {pipeline_mode = #tpu.pipeline_mode<synchronous>, transform_indices = @transform_1, window_bounds = array<i64: 75, 6>}, {pipeline_mode = #tpu.pipeline_mode<synchronous>, transform_indices = @transform_2, window_bounds = array<i64: 1, 6>}, {transform_indices = @transform_3, window_bounds = array<i64: 1, 196, 6>}]} {
    %c0 = arith.constant 0 : index
    %c0_0 = arith.constant 0 : index
    %0 = vector.load %arg2[%c0, %c0_0] : memref<75x6xf32, #tpu.memory_space<vmem>>, vector<75x6xf32>
    %c0_1 = arith.constant 0 : index
    %c0_2 = arith.constant 0 : index
    %c0_3 = arith.constant 0 : index
    %c0_4 = arith.constant 0 : index
    %1 = vector.load %arg1[%c0_1, %c0_2, %c0_3, %c0_4] : memref<1x4x196x75xf32, #tpu.memory_space<vmem>>, vector<1x1x196x75xf32>
    %2 = vector.shape_cast %1 : vector<1x1x196x75xf32> to vector<196x75xf32>
    %cst = arith.constant dense<0.000000e+00> : vector<196x6xf32>
    %3 = tpu.matmul %2, %0, %cst {dimension_numbers = #tpu.dot_dimension_numbers<[1], [0], [0], [1], [0, 0, 1, 1], [], []>} : vector<196x75xf32>, vector<75x6xf32>, vector<196x6xf32> -> vector<196x6xf32>
    %c0_5 = arith.constant 0 : index
    %c1 = arith.constant 1 : index
    %c0_6 = arith.constant 0 : index
    %c0_7 = arith.constant 0 : index
    %4 = vector.load %arg1[%c0_5, %c1, %c0_6, %c0_7] : memref<1x4x196x75xf32, #tpu.memory_space<vmem>>, vector<1x1x196x75xf32>
    %5 = vector.shape_cast %4 : vector<1x1x196x75xf32> to vector<196x75xf32>
    %cst_8 = arith.constant dense<0.000000e+00> : vector<196x6xf32>
    %6 = tpu.matmul %5, %0, %cst_8 {dimension_numbers = #tpu.dot_dimension_numbers<[1], [0], [0], [1], [0, 0, 1, 1], [], []>} : vector<196x75xf32>, vector<75x6xf32>, vector<196x6xf32> -> vector<196x6xf32>
    %7 = arith.maximumf %3, %6 : vector<196x6xf32>
    %c0_9 = arith.constant 0 : index
    %c2 = arith.constant 2 : index
    %c0_10 = arith.constant 0 : index
    %c0_11 = arith.constant 0 : index
    %8 = vector.load %arg1[%c0_9, %c2, %c0_10, %c0_11] : memref<1x4x196x75xf32, #tpu.memory_space<vmem>>, vector<1x1x196x75xf32>
    %9 = vector.shape_cast %8 : vector<1x1x196x75xf32> to vector<196x75xf32>
    %cst_12 = arith.constant dense<0.000000e+00> : vector<196x6xf32>
    %10 = tpu.matmul %9, %0, %cst_12 {dimension_numbers = #tpu.dot_dimension_numbers<[1], [0], [0], [1], [0, 0, 1, 1], [], []>} : vector<196x75xf32>, vector<75x6xf32>, vector<196x6xf32> -> vector<196x6xf32>
    %11 = arith.maximumf %7, %10 : vector<196x6xf32>
    %c0_13 = arith.constant 0 : index
    %c3 = arith.constant 3 : index
    %c0_14 = arith.constant 0 : index
    %c0_15 = arith.constant 0 : index
    %12 = vector.load %arg1[%c0_13, %c3, %c0_14, %c0_15] : memref<1x4x196x75xf32, #tpu.memory_space<vmem>>, vector<1x1x196x75xf32>
    %13 = vector.shape_cast %12 : vector<1x1x196x75xf32> to vector<196x75xf32>
    %cst_16 = arith.constant dense<0.000000e+00> : vector<196x6xf32>
    %14 = tpu.matmul %13, %0, %cst_16 {dimension_numbers = #tpu.dot_dimension_numbers<[1], [0], [0], [1], [0, 0, 1, 1], [], []>} : vector<196x75xf32>, vector<75x6xf32>, vector<196x6xf32> -> vector<196x6xf32>
    %15 = arith.maximumf %11, %14 : vector<196x6xf32>
    %c0_17 = arith.constant 0 : index
    %c0_18 = arith.constant 0 : index
    %16 = vector.load %arg3[%c0_17, %c0_18] : memref<1x6xf32, #tpu.memory_space<vmem>>, vector<1x6xf32>
    %17 = vector.broadcast %16 : vector<1x6xf32> to vector<196x6xf32>
    %18 = arith.addf %15, %17 : vector<196x6xf32>
    %cst_19 = arith.constant 0.000000e+00 : f32
    %19 = vector.broadcast %cst_19 : f32 to vector<196x6xf32>
    %20 = arith.maximumf %18, %19 : vector<196x6xf32>
    %c0_20 = arith.constant 0 : index
    %c0_21 = arith.constant 0 : index
    %c0_22 = arith.constant 0 : index
    %21 = vector.load %arg4[%c0_20, %c0_21, %c0_22] : memref<1x196x6xf32, #tpu.memory_space<vmem>>, vector<1x196x6xf32>
    %22 = vector.shape_cast %21 : vector<1x196x6xf32> to vector<196x6xf32>
    %23 = vector.shape_cast %20 : vector<196x6xf32> to vector<1x196x6xf32>
    tpu.vector_store %arg4[%c0_20, %c0_21, %c0_22], %23 {strides = array<i32>} : memref<1x196x6xf32, #tpu.memory_space<vmem>>, vector<1x196x6xf32>,
    return
  }
  func.func @transform_0(%arg0: i32) -> (i32, i32, i32, i32) {
    %c0_i32 = arith.constant 0 : i32
    %c0_i32_0 = arith.constant 0 : i32
    %c0_i32_1 = arith.constant 0 : i32
    %c0_i32_2 = arith.constant 0 : i32
    return %arg0, %c0_i32, %c0_i32_0, %c0_i32_1 : i32, i32, i32, i32
  }
  func.func @transform_1(%arg0: i32) -> (i32, i32) {
    %c0_i32 = arith.constant 0 : i32
    %c0_i32_0 = arith.constant 0 : i32
    %c0_i32_1 = arith.constant 0 : i32
    return %c0_i32, %c0_i32_0 : i32, i32
  }
  func.func @transform_2(%arg0: i32) -> (i32, i32) {
    %c0_i32 = arith.constant 0 : i32
    %c0_i32_0 = arith.constant 0 : i32
    %c0_i32_1 = arith.constant 0 : i32
    return %c0_i32, %c0_i32_0 : i32, i32
  }
  func.func @transform_3(%arg0: i32) -> (i32, i32, i32) {
    %c0_i32 = arith.constant 0 : i32
    %c0_i32_0 = arith.constant 0 : i32
    %c0_i32_1 = arith.constant 0 : i32
    return %arg0, %c0_i32, %c0_i32_0 : i32, i32, i32
  }
}

module attributes {stable_mosaic.version = 11 : i64} {
  func.func @conv_relu_pool_kernel(%arg0: i32, %arg1: memref<1x4x25x150xf32, #tpu.memory_space<vmem>>, %arg2: memref<150x16xf32, #tpu.memory_space<vmem>>, %arg3: memref<1x16xf32, #tpu.memory_space<vmem>>, %arg4: memref<1x25x16xf32, #tpu.memory_space<vmem>>) attributes {dimension_semantics = [#tpu.dimension_semantics<parallel>], iteration_bounds = array<i64: 2>, scalar_prefetch = 0 : i64, scratch_operands = 0 : i64, tpu.core_type = #tpu.core_type<tc>, window_params = [{transform_indices = @transform_0, window_bounds = array<i64: 1, 4, 25, 150>}, {pipeline_mode = #tpu.pipeline_mode<synchronous>, transform_indices = @transform_1, window_bounds = array<i64: 150, 16>}, {pipeline_mode = #tpu.pipeline_mode<synchronous>, transform_indices = @transform_2, window_bounds = array<i64: 1, 16>}, {transform_indices = @transform_3, window_bounds = array<i64: 1, 25, 16>}]} {
    %c0 = arith.constant 0 : index
    %c0_0 = arith.constant 0 : index
    %0 = vector.load %arg2[%c0, %c0_0] : memref<150x16xf32, #tpu.memory_space<vmem>>, vector<150x16xf32>
    %c0_1 = arith.constant 0 : index
    %c0_2 = arith.constant 0 : index
    %c0_3 = arith.constant 0 : index
    %c0_4 = arith.constant 0 : index
    %1 = vector.load %arg1[%c0_1, %c0_2, %c0_3, %c0_4] : memref<1x4x25x150xf32, #tpu.memory_space<vmem>>, vector<1x1x25x150xf32>
    %2 = vector.shape_cast %1 : vector<1x1x25x150xf32> to vector<25x150xf32>
    %cst = arith.constant dense<0.000000e+00> : vector<25x16xf32>
    %3 = tpu.matmul %2, %0, %cst {dimension_numbers = #tpu.dot_dimension_numbers<[1], [0], [0], [1], [0, 0, 1, 1], [], []>} : vector<25x150xf32>, vector<150x16xf32>, vector<25x16xf32> -> vector<25x16xf32>
    %c0_5 = arith.constant 0 : index
    %c1 = arith.constant 1 : index
    %c0_6 = arith.constant 0 : index
    %c0_7 = arith.constant 0 : index
    %4 = vector.load %arg1[%c0_5, %c1, %c0_6, %c0_7] : memref<1x4x25x150xf32, #tpu.memory_space<vmem>>, vector<1x1x25x150xf32>
    %5 = vector.shape_cast %4 : vector<1x1x25x150xf32> to vector<25x150xf32>
    %cst_8 = arith.constant dense<0.000000e+00> : vector<25x16xf32>
    %6 = tpu.matmul %5, %0, %cst_8 {dimension_numbers = #tpu.dot_dimension_numbers<[1], [0], [0], [1], [0, 0, 1, 1], [], []>} : vector<25x150xf32>, vector<150x16xf32>, vector<25x16xf32> -> vector<25x16xf32>
    %7 = arith.maximumf %3, %6 : vector<25x16xf32>
    %c0_9 = arith.constant 0 : index
    %c2 = arith.constant 2 : index
    %c0_10 = arith.constant 0 : index
    %c0_11 = arith.constant 0 : index
    %8 = vector.load %arg1[%c0_9, %c2, %c0_10, %c0_11] : memref<1x4x25x150xf32, #tpu.memory_space<vmem>>, vector<1x1x25x150xf32>
    %9 = vector.shape_cast %8 : vector<1x1x25x150xf32> to vector<25x150xf32>
    %cst_12 = arith.constant dense<0.000000e+00> : vector<25x16xf32>
    %10 = tpu.matmul %9, %0, %cst_12 {dimension_numbers = #tpu.dot_dimension_numbers<[1], [0], [0], [1], [0, 0, 1, 1], [], []>} : vector<25x150xf32>, vector<150x16xf32>, vector<25x16xf32> -> vector<25x16xf32>
    %11 = arith.maximumf %7, %10 : vector<25x16xf32>
    %c0_13 = arith.constant 0 : index
    %c3 = arith.constant 3 : index
    %c0_14 = arith.constant 0 : index
    %c0_15 = arith.constant 0 : index
    %12 = vector.load %arg1[%c0_13, %c3, %c0_14, %c0_15] : memref<1x4x25x150xf32, #tpu.memory_space<vmem>>, vector<1x1x25x150xf32>
    %13 = vector.shape_cast %12 : vector<1x1x25x150xf32> to vector<25x150xf32>
    %cst_16 = arith.constant dense<0.000000e+00> : vector<25x16xf32>
    %14 = tpu.matmul %13, %0, %cst_16 {dimension_numbers = #tpu.dot_dimension_numbers<[1], [0], [0], [1], [0, 0, 1, 1], [], []>} : vector<25x150xf32>, vector<150x16xf32>, vector<25x16xf32> -> vector<25x16xf32>
    %15 = arith.maximumf %11, %14 : vector<25x16xf32>
    %c0_17 = arith.constant 0 : index
    %c0_18 = arith.constant 0 : index
    %16 = vector.load %arg3[%c0_17, %c0_18] : memref<1x16xf32, #tpu.memory_space<vmem>>, vector<1x16xf32>
    %17 = vector.broadcast %16 : vector<1x16xf32> to vector<25x16xf32>
    %18 = arith.addf %15, %17 : vector<25x16xf32>
    %cst_19 = arith.constant 0.000000e+00 : f32
    %19 = vector.broadcast %cst_19 : f32 to vector<25x16xf32>
    %20 = arith.maximumf %18, %19 : vector<25x16xf32>
    %c0_20 = arith.constant 0 : index
    %c0_21 = arith.constant 0 : index
    %c0_22 = arith.constant 0 : index
    %21 = vector.load %arg4[%c0_20, %c0_21, %c0_22] : memref<1x25x16xf32, #tpu.memory_space<vmem>>, vector<1x25x16xf32>
    %22 = vector.shape_cast %21 : vector<1x25x16xf32> to vector<25x16xf32>
    %23 = vector.shape_cast %20 : vector<25x16xf32> to vector<1x25x16xf32>
    tpu.vector_store %arg4[%c0_20, %c0_21, %c0_22], %23 {strides = array<i32>} : memref<1x25x16xf32, #tpu.memory_space<vmem>>, vector<1x25x16xf32>,
    return
  }
  func.func @transform_0(%arg0: i32) -> (i32, i32, i32, i32) {
    %c0_i32 = arith.constant 0 : i32
    %c0_i32_0 = arith.constant 0 : i32
    %c0_i32_1 = arith.constant 0 : i32
    %c0_i32_2 = arith.constant 0 : i32
    return %arg0, %c0_i32, %c0_i32_0, %c0_i32_1 : i32, i32, i32, i32
  }
  func.func @transform_1(%arg0: i32) -> (i32, i32) {
    %c0_i32 = arith.constant 0 : i32
    %c0_i32_0 = arith.constant 0 : i32
    %c0_i32_1 = arith.constant 0 : i32
    return %c0_i32, %c0_i32_0 : i32, i32
  }
  func.func @transform_2(%arg0: i32) -> (i32, i32) {
    %c0_i32 = arith.constant 0 : i32
    %c0_i32_0 = arith.constant 0 : i32
    %c0_i32_1 = arith.constant 0 : i32
    return %c0_i32, %c0_i32_0 : i32, i32
  }
  func.func @transform_3(%arg0: i32) -> (i32, i32, i32) {
    %c0_i32 = arith.constant 0 : i32
    %c0_i32_0 = arith.constant 0 : i32
    %c0_i32_1 = arith.constant 0 : i32
    return %arg0, %c0_i32, %c0_i32_0 : i32, i32, i32
  }
}

module attributes {stable_mosaic.version = 11 : i64} {
  func.func @fc_head_kernel(%arg0: i32, %arg1: memref<2x400xf32, #tpu.memory_space<vmem>>, %arg2: memref<400x120xf32, #tpu.memory_space<vmem>>, %arg3: memref<1x120xf32, #tpu.memory_space<vmem>>, %arg4: memref<120x84xf32, #tpu.memory_space<vmem>>, %arg5: memref<1x84xf32, #tpu.memory_space<vmem>>, %arg6: memref<84x10xf32, #tpu.memory_space<vmem>>, %arg7: memref<1x10xf32, #tpu.memory_space<vmem>>, %arg8: memref<2x10xf32, #tpu.memory_space<vmem>>) attributes {dimension_semantics = [#tpu.dimension_semantics<parallel>], iteration_bounds = array<i64: 1>, scalar_prefetch = 0 : i64, scratch_operands = 0 : i64, tpu.core_type = #tpu.core_type<tc>, window_params = [{transform_indices = @transform_0, window_bounds = array<i64: 2, 400>}, {pipeline_mode = #tpu.pipeline_mode<synchronous>, transform_indices = @transform_1, window_bounds = array<i64: 400, 120>}, {pipeline_mode = #tpu.pipeline_mode<synchronous>, transform_indices = @transform_2, window_bounds = array<i64: 1, 120>}, {pipeline_mode = #tpu.pipeline_mode<synchronous>, transform_indices = @transform_3, window_bounds = array<i64: 120, 84>}, {pipeline_mode = #tpu.pipeline_mode<synchronous>, transform_indices = @transform_4, window_bounds = array<i64: 1, 84>}, {pipeline_mode = #tpu.pipeline_mode<synchronous>, transform_indices = @transform_5, window_bounds = array<i64: 84, 10>}, {pipeline_mode = #tpu.pipeline_mode<synchronous>, transform_indices = @transform_6, window_bounds = array<i64: 1, 10>}, {transform_indices = @transform_7, window_bounds = array<i64: 2, 10>}]} {
    %c0 = arith.constant 0 : index
    %c0_0 = arith.constant 0 : index
    %0 = vector.load %arg1[%c0, %c0_0] : memref<2x400xf32, #tpu.memory_space<vmem>>, vector<2x400xf32>
    %c0_1 = arith.constant 0 : index
    %c0_2 = arith.constant 0 : index
    %1 = vector.load %arg2[%c0_1, %c0_2] : memref<400x120xf32, #tpu.memory_space<vmem>>, vector<400x120xf32>
    %cst = arith.constant dense<0.000000e+00> : vector<2x120xf32>
    %2 = tpu.matmul %0, %1, %cst {dimension_numbers = #tpu.dot_dimension_numbers<[1], [0], [0], [1], [0, 0, 1, 1], [], []>} : vector<2x400xf32>, vector<400x120xf32>, vector<2x120xf32> -> vector<2x120xf32>
    %c0_3 = arith.constant 0 : index
    %c0_4 = arith.constant 0 : index
    %3 = vector.load %arg3[%c0_3, %c0_4] : memref<1x120xf32, #tpu.memory_space<vmem>>, vector<1x120xf32>
    %4 = vector.broadcast %3 : vector<1x120xf32> to vector<2x120xf32>
    %5 = arith.addf %2, %4 : vector<2x120xf32>
    %cst_5 = arith.constant 0.000000e+00 : f32
    %6 = vector.broadcast %cst_5 : f32 to vector<2x120xf32>
    %7 = arith.maximumf %5, %6 : vector<2x120xf32>
    %c0_6 = arith.constant 0 : index
    %c0_7 = arith.constant 0 : index
    %8 = vector.load %arg4[%c0_6, %c0_7] : memref<120x84xf32, #tpu.memory_space<vmem>>, vector<120x84xf32>
    %cst_8 = arith.constant dense<0.000000e+00> : vector<2x84xf32>
    %9 = tpu.matmul %7, %8, %cst_8 {dimension_numbers = #tpu.dot_dimension_numbers<[1], [0], [0], [1], [0, 0, 1, 1], [], []>} : vector<2x120xf32>, vector<120x84xf32>, vector<2x84xf32> -> vector<2x84xf32>
    %c0_9 = arith.constant 0 : index
    %c0_10 = arith.constant 0 : index
    %10 = vector.load %arg5[%c0_9, %c0_10] : memref<1x84xf32, #tpu.memory_space<vmem>>, vector<1x84xf32>
    %11 = vector.broadcast %10 : vector<1x84xf32> to vector<2x84xf32>
    %12 = arith.addf %9, %11 : vector<2x84xf32>
    %cst_11 = arith.constant 0.000000e+00 : f32
    %13 = vector.broadcast %cst_11 : f32 to vector<2x84xf32>
    %14 = arith.maximumf %12, %13 : vector<2x84xf32>
    %c0_12 = arith.constant 0 : index
    %c0_13 = arith.constant 0 : index
    %15 = vector.load %arg6[%c0_12, %c0_13] : memref<84x10xf32, #tpu.memory_space<vmem>>, vector<84x10xf32>
    %cst_14 = arith.constant dense<0.000000e+00> : vector<2x10xf32>
    %16 = tpu.matmul %14, %15, %cst_14 {dimension_numbers = #tpu.dot_dimension_numbers<[1], [0], [0], [1], [0, 0, 1, 1], [], []>} : vector<2x84xf32>, vector<84x10xf32>, vector<2x10xf32> -> vector<2x10xf32>
    %c0_15 = arith.constant 0 : index
    %c0_16 = arith.constant 0 : index
    %17 = vector.load %arg7[%c0_15, %c0_16] : memref<1x10xf32, #tpu.memory_space<vmem>>, vector<1x10xf32>
    %18 = vector.broadcast %17 : vector<1x10xf32> to vector<2x10xf32>
    %19 = arith.addf %16, %18 : vector<2x10xf32>
    %cst_17 = arith.constant dense<0xFF800000> : vector<2xf32>
    %20 = vector.multi_reduction <maximumf>, %19, %cst_17 [1] : vector<2x10xf32> to vector<2xf32>
    %21 = vector.shape_cast %20 : vector<2xf32> to vector<2x1xf32>
    %22 = vector.broadcast %21 : vector<2x1xf32> to vector<2x10xf32>
    %23 = arith.subf %19, %22 : vector<2x10xf32>
    %24 = math.exp %23 : vector<2x10xf32>
    %cst_18 = arith.constant dense<0.000000e+00> : vector<2xf32>
    %25 = vector.multi_reduction <add>, %24, %cst_18 [1] : vector<2x10xf32> to vector<2xf32>
    %26 = vector.shape_cast %25 : vector<2xf32> to vector<2x1xf32>
    %27 = tpu.reciprocal %26 : vector<2x1xf32> -> vector<2x1xf32>
    %28 = vector.broadcast %27 : vector<2x1xf32> to vector<2x10xf32>
    %29 = arith.mulf %24, %28 : vector<2x10xf32>
    %c0_19 = arith.constant 0 : index
    %c0_20 = arith.constant 0 : index
    %30 = vector.load %arg8[%c0_19, %c0_20] : memref<2x10xf32, #tpu.memory_space<vmem>>, vector<2x10xf32>
    tpu.vector_store %arg8[%c0_19, %c0_20], %29 {strides = array<i32>} : memref<2x10xf32, #tpu.memory_space<vmem>>, vector<2x10xf32>,
    return
  }
  func.func @transform_0(%arg0: i32) -> (i32, i32) {
    %c0_i32 = arith.constant 0 : i32
    %c0_i32_0 = arith.constant 0 : i32
    return %arg0, %c0_i32 : i32, i32
  }
  func.func @transform_1(%arg0: i32) -> (i32, i32) {
    %c0_i32 = arith.constant 0 : i32
    %c0_i32_0 = arith.constant 0 : i32
    %c0_i32_1 = arith.constant 0 : i32
    return %c0_i32, %c0_i32_0 : i32, i32
  }
  func.func @transform_2(%arg0: i32) -> (i32, i32) {
    %c0_i32 = arith.constant 0 : i32
    %c0_i32_0 = arith.constant 0 : i32
    %c0_i32_1 = arith.constant 0 : i32
    return %c0_i32, %c0_i32_0 : i32, i32
  }
  func.func @transform_3(%arg0: i32) -> (i32, i32) {
    %c0_i32 = arith.constant 0 : i32
    %c0_i32_0 = arith.constant 0 : i32
    %c0_i32_1 = arith.constant 0 : i32
    return %c0_i32, %c0_i32_0 : i32, i32
  }
  func.func @transform_4(%arg0: i32) -> (i32, i32) {
    %c0_i32 = arith.constant 0 : i32
    %c0_i32_0 = arith.constant 0 : i32
    %c0_i32_1 = arith.constant 0 : i32
    return %c0_i32, %c0_i32_0 : i32, i32
  }
  func.func @transform_5(%arg0: i32) -> (i32, i32) {
    %c0_i32 = arith.constant 0 : i32
    %c0_i32_0 = arith.constant 0 : i32
    %c0_i32_1 = arith.constant 0 : i32
    return %c0_i32, %c0_i32_0 : i32, i32
  }
  func.func @transform_6(%arg0: i32) -> (i32, i32) {
    %c0_i32 = arith.constant 0 : i32
    %c0_i32_0 = arith.constant 0 : i32
    %c0_i32_1 = arith.constant 0 : i32
    return %c0_i32, %c0_i32_0 : i32, i32
  }
  func.func @transform_7(%arg0: i32) -> (i32, i32) {
    %c0_i32 = arith.constant 0 : i32
    %c0_i32_0 = arith.constant 0 : i32
    return %arg0, %c0_i32 : i32, i32
  }
}

</mosaic_0001>

<bundles_post_ra>
// kernel: lenet5_forward.3
= control target key start
LH: loop header
LB: loop body
LE: loop exit
PB: predicated region body
PF: predicated region fallthrough
CT: control target
= control target key end

     0   :  { %s1395_s12 = smov 0   ;;  %s1729_s0 = inlined_call_operand.vmem [shape: f32[2,4,196,75], index: 0, kind: input, shape index: {}]   ;;  %s1730_s1 = inlined_call_operand.vmem [shape: f32[75,6], index: 1, kind: input, shape index: {}]   ;;  %s1731_s2 = inlined_call_operand.vmem [shape: f32[1,6], index: 2, kind: input, shape index: {}]   ;;  %s1732_s3 = inlined_call_operand.vmem [shape: f32[2,196,6], index: 3, kind: output, shape index: {}]  }
   0x1 LB: > { %s1168_s13 = sadd.s32 4294967295, %s1373_s12   ;;  %p1172_p0 = scmp.ge.s32.totalorder %s1373_s12, 1  ;;  %s1373_s12 = sphi %s1395_s12, %s13_s12  }
   0x2   : > { %p137_p1 = scmp.lt.s32.totalorder %s1373_s12, 3 }
   0x4   : > { %p138_p2 = pnand %p1172_p0, %p137_p1 }
   0x5   : > { %p161_p3 = scmp.lt.s32.totalorder (!%p138_p2), %s1168_s13, 1 }
   0x6   : > { %141 = sbr.rel (%p138_p2) target bundleno = 364 (0x16c), region = 32 }
   0xb   : > { %v180_v0 = vld [vmem:[%s1730_s1 + $0x48] sm:$0x7]  ;;  %vm282_vm0 = vcmask 1042432   ;;  %v179_v1 = vld [vmem:[%s1730_s1 + $0x40] sm:$0xff]  ;;  %v178_v2 = vld [vmem:[%s1730_s1 + $0x38] sm:$0xff]  ;;  %s1734_s13 = smov (!%p161_p3, %s1168_s13), 1 }
   0xc   : > { %1277 = vmatpush.msk.msra.mxu2 %vm282_vm0, %v180_v0  ;;  %1328 = vmatpush.msk.msra.mxu3 %vm282_vm0, %v180_v0  ;;  %v177_v3 = vld [vmem:[%s1730_s1 + $0x30] sm:$0xff]  ;;  %v176_v4 = vld [vmem:[%s1730_s1 + $0x28] sm:$0xff]  ;;  %v175_v5 = vld [vmem:[%s1730_s1 + $0x20] sm:$0xff]  ;;  %s1356_s28 = smul.u32 800, %s1734_s13  ;;  %vm206_vm1 = vcmask 613376   ;;  %vm1086_vm2 = vcmask 48128  }
   0xd   : > { %1175 = vmatpush.msk.msra.mxu0 %vm282_vm0, %v180_v0  ;;  %1226 = vmatpush.msk.msra.mxu1 %vm282_vm0, %v180_v0  ;;  %v174_v6 = vld [vmem:[%s1730_s1 + $0x18] sm:$0xff]  ;;  %v173_v7 = vld [vmem:[%s1730_s1 + $0x10] sm:$0xff]  ;;  %v172_v8 = vld [vmem:[%s1730_s1 + $0x8] sm:$0xff]  ;;  %s1357_s15 = smul.u32 200, %s1734_s13  ;;  %vm1111_vm3 = vcmask 44032  }
   0xe   : > { %704 = vmatpush.msra.mxu2 %v179_v1  ;;  %922 = vmatpush.msra.mxu3 %v179_v1  ;;  %s1436_s8 = scalar_lea.vmem %s1729_s0, %s1356_s28  ;;  %v171_v9 = vld [vmem:[%s1730_s1] sm:$0xff] }
   0xf   : > { %293 = vmatpush.msra.mxu0 %v179_v1  ;;  %486 = vmatpush.msra.mxu1 %v179_v1  ;;  %v1252_v10 = vld [vmem:[%s1436_s8 + $0x190] sm:$0xff]  ;;  %v1303_v11 = vld [vmem:[%s1436_s8 + $0x258] sm:$0xff]  ;;  %v181_v12 = vld [vmem:[%s1436_s8] sm:$0xff]  ;;  %s1593_s13 = scalar_lea.vmem %s1732_s3, %s1357_s15 }
  0x10   : > { %705 = vmatpush.msra.mxu2 %v178_v2  ;;  %923 = vmatpush.msra.mxu3 %v178_v2  ;;  %v1201_v13 = vld [vmem:[%s1436_s8 + $0xc8] sm:$0xff]  ;;  %v1253_v14 = vld [vmem:[%s1436_s8 + $0x198] sm:$0xff]  ;;  %v1304_v15 = vld [vmem:[%s1436_s8 + $0x260] sm:$0xff] }
  0x11   : > { %294 = vmatpush.msra.mxu0 %v178_v2  ;;  %487 = vmatpush.msra.mxu1 %v178_v2  ;;  %v182_v16 = vld [vmem:[%s1436_s8 + $0x8] sm:$0xff]  ;;  %v1202_v17 = vld [vmem:[%s1436_s8 + $0xd0] sm:$0xff]  ;;  %v1254_v18 = vld [vmem:[%s1436_s8 + $0x1a0] sm:$0xff] }
  0x12   : > { %706 = vmatpush.msra.mxu2 %v177_v3  ;;  %924 = vmatpush.msra.mxu3 %v177_v3  ;;  %v1305_v19 = vld [vmem:[%s1436_s8 + $0x268] sm:$0xff]  ;;  %v183_v20 = vld [vmem:[%s1436_s8 + $0x10] sm:$0xff]  ;;  %v1203_v21 = vld [vmem:[%s1436_s8 + $0xd8] sm:$0xff] }
  0x13   : > { %295 = vmatpush.msra.mxu0 %v177_v3  ;;  %488 = vmatpush.msra.mxu1 %v177_v3  ;;  %v1255_v22 = vld [vmem:[%s1436_s8 + $0x1a8] sm:$0xff]  ;;  %v1306_v23 = vld [vmem:[%s1436_s8 + $0x270] sm:$0xff]  ;;  %v184_v24 = vld [vmem:[%s1436_s8 + $0x18] sm:$0xff] }
  0x14   : > { %707 = vmatpush.msra.mxu2 %v176_v4  ;;  %925 = vmatpush.msra.mxu3 %v176_v4  ;;  %v1204_v25 = vld [vmem:[%s1436_s8 + $0xe0] sm:$0xff]  ;;  %v1256_v26 = vld [vmem:[%s1436_s8 + $0x1b0] sm:$0xff]  ;;  %v1307_v27 = vld [vmem:[%s1436_s8 + $0x278] sm:$0xff] }
  0x15   : > { %296 = vmatpush.msra.mxu0 %v176_v4  ;;  %489 = vmatpush.msra.mxu1 %v176_v4  ;;  %v185_v28 = vld [vmem:[%s1436_s8 + $0x20] sm:$0xff]  ;;  %v1205_v29 = vld [vmem:[%s1436_s8 + $0xe8] sm:$0xff]  ;;  %v1257_v30 = vld [vmem:[%s1436_s8 + $0x1b8] sm:$0xff] }
  0x16   : > { %708 = vmatpush.msra.mxu2 %v175_v5  ;;  %926 = vmatpush.msra.mxu3 %v175_v5  ;;  %v1308_v31 = vld [vmem:[%s1436_s8 + $0x280] sm:$0xff]  ;;  %v186_v32 = vld [vmem:[%s1436_s8 + $0x28] sm:$0xff]  ;;  %v1206_v33 = vld [vmem:[%s1436_s8 + $0xf0] sm:$0xff] }
  0x17   : > { %297 = vmatpush.msra.mxu0 %v175_v5  ;;  %490 = vmatpush.msra.mxu1 %v175_v5  ;;  %v1258_v34 = vld [vmem:[%s1436_s8 + $0x1c0] sm:$0xff]  ;;  %v1309_v35 = vld [vmem:[%s1436_s8 + $0x288] sm:$0xff]  ;;  %v187_v36 = vld [vmem:[%s1436_s8 + $0x30] sm:$0xff] }
  0x18   : > { %709 = vmatpush.msra.mxu2 %v174_v6  ;;  %927 = vmatpush.msra.mxu3 %v174_v6  ;;  %v1207_v37 = vld [vmem:[%s1436_s8 + $0xf8] sm:$0xff]  ;;  %v1259_v38 = vld [vmem:[%s1436_s8 + $0x1c8] sm:$0xff]  ;;  %v1310_v39 = vld [vmem:[%s1436_s8 + $0x290] sm:$0xff] }
  0x19   : > { %298 = vmatpush.msra.mxu0 %v174_v6  ;;  %491 = vmatpush.msra.mxu1 %v174_v6  ;;  %v188_v40 = vld [vmem:[%s1436_s8 + $0x38] sm:$0xff]  ;;  %v1208_v41 = vld [vmem:[%s1436_s8 + $0x100] sm:$0xff]  ;;  %v1260_v42 = vld [vmem:[%s1436_s8 + $0x1d0] sm:$0xff] }
  0x1a   : > { %710 = vmatpush.msra.mxu2 %v173_v7  ;;  %928 = vmatpush.msra.mxu3 %v173_v7  ;;  %v1311_v43 = vld [vmem:[%s1436_s8 + $0x298] sm:$0xff]  ;;  %v189_v44 = vld [vmem:[%s1436_s8 + $0x40] sm:$0xff]  ;;  %v1209_v45 = vld [vmem:[%s1436_s8 + $0x108] sm:$0xff] }
  0x1b   : > { %299 = vmatpush.msra.mxu0 %v173_v7  ;;  %492 = vmatpush.msra.mxu1 %v173_v7  ;;  %v1261_v46 = vld [vmem:[%s1436_s8 + $0x1d8] sm:$0xff]  ;;  %v1312_v47 = vld [vmem:[%s1436_s8 + $0x2a0] sm:$0xff]  ;;  %v190_v48 = vld [vmem:[%s1436_s8 + $0x48] sm:$0xff] }
  0x1c   : > { %711 = vmatpush.msra.mxu2 %v172_v8  ;;  %929 = vmatpush.msra.mxu3 %v172_v8  ;;  %v1210_v49 = vld [vmem:[%s1436_s8 + $0x110] sm:$0xff]  ;;  %v1262_v50 = vld [vmem:[%s1436_s8 + $0x1e0] sm:$0xff]  ;;  %v1313_v51 = vld [vmem:[%s1436_s8 + $0x2a8] sm:$0xff] }
  0x1d   : > { %300 = vmatpush.msra.mxu0 %v172_v8  ;;  %493 = vmatpush.msra.mxu1 %v172_v8  ;;  %v191_v52 = vld [vmem:[%s1436_s8 + $0x50] sm:$0xff]  ;;  %v1211_v53 = vld [vmem:[%s1436_s8 + $0x118] sm:$0xff]  ;;  %v1263_v54 = vld [vmem:[%s1436_s8 + $0x1e8] sm:$0xff] }
  0x1e   : > { %712 = vmatpush.msra.mxu2 %v171_v9  ;;  %930 = vmatpush.msra.mxu3 %v171_v9  ;;  %v1314_v55 = vld [vmem:[%s1436_s8 + $0x2b0] sm:$0xff]  ;;  %v192_v56 = vld [vmem:[%s1436_s8 + $0x58] sm:$0xff]  ;;  %v1212_v57 = vld [vmem:[%s1436_s8 + $0x120] sm:$0xff] }
  0x1f   : > { %1278 = vmatmul.msk.f32.vlgmr.msra.gmra.mxu2 %vm206_vm1, %v1252_v10  ;;  %1329 = vmatmul.msk.f32.vlgmr.msra.gmra.mxu3 %vm206_vm1, %v1303_v11  ;;  %v1264_v58 = vld [vmem:[%s1436_s8 + $0x1f0] sm:$0xff]  ;;  %v1315_v59 = vld [vmem:[%s1436_s8 + $0x2b8] sm:$0xff]  ;;  %v193_v60 = vld [vmem:[%s1436_s8 + $0x60] sm:$0xff] }
  0x20   : > { %301 = vmatpush.msra.mxu0 %v171_v9  ;;  %494 = vmatpush.msra.mxu1 %v171_v9  ;;  %v1213_v61 = vld [vmem:[%s1436_s8 + $0x128] sm:$0xff]  ;;  %v1265_v62 = vld [vmem:[%s1436_s8 + $0x1f8] sm:$0xff]  ;;  %v1316_v63 = vld [vmem:[%s1436_s8 + $0x2c0] sm:$0xff] }
  0x21   : > { %1176 = vmatmul.msk.f32.vlgmr.msra.gmra.mxu0 %vm206_vm1, %v181_v12  ;;  %1227 = vmatmul.msk.f32.vlgmr.msra.gmra.mxu1 %vm206_vm1, %v1201_v13  ;;  %v194_v0 = vld [vmem:[%s1436_s8 + $0x68] sm:$0xff]  ;;  %v1214_v1 = vld [vmem:[%s1436_s8 + $0x130] sm:$0xff]  ;;  %v1266_v2 = vld [vmem:[%s1436_s8 + $0x200] sm:$0xff] }
  0x22   : > { %v1317_v3 = vld [vmem:[%s1436_s8 + $0x2c8] sm:$0xff]  ;;  %v195_v4 = vld [vmem:[%s1436_s8 + $0x70] sm:$0xff]  ;;  %v1215_v5 = vld [vmem:[%s1436_s8 + $0x138] sm:$0xff] }
  0x23   : > { %v1267_v6 = vld [vmem:[%s1436_s8 + $0x208] sm:$0xff]  ;;  %v1318_v7 = vld [vmem:[%s1436_s8 + $0x2d0] sm:$0xff]  ;;  %v196_v8 = vld [vmem:[%s1436_s8 + $0x78] sm:$0xff] }
  0x24   : > { %v1216_v9 = vld [vmem:[%s1436_s8 + $0x140] sm:$0xff]  ;;  %v1268_v10 = vld [vmem:[%s1436_s8 + $0x210] sm:$0xff]  ;;  %v1319_v11 = vld [vmem:[%s1436_s8 + $0x2d8] sm:$0xff] }
  0x27   : > { %1279 = vmatmul.msk.f32.gmra.mxu2 %vm206_vm1, %v1253_v14  ;;  %1330 = vmatmul.msk.f32.gmra.mxu3 %vm206_vm1, %v1304_v15  ;;  %v197_v14 = vld [vmem:[%s1436_s8 + $0x80] sm:$0xff]  ;;  %v1217_v15 = vld [vmem:[%s1436_s8 + $0x148] sm:$0xff] }
  0x29   : > { %1177 = vmatmul.msk.f32.gmra.mxu0 %vm206_vm1, %v182_v16  ;;  %1228 = vmatmul.msk.f32.gmra.mxu1 %vm206_vm1, %v1202_v17 }
  0x2f   : > { %1280 = vmatmul.msk.f32.gmra.mxu2 %vm206_vm1, %v1254_v18  ;;  %1331 = vmatmul.msk.f32.gmra.mxu3 %vm206_vm1, %v1305_v19 }
  0x31   : > { %1178 = vmatmul.msk.f32.gmra.mxu0 %vm206_vm1, %v183_v20  ;;  %1229 = vmatmul.msk.f32.gmra.mxu1 %vm206_vm1, %v1203_v21  ;;  %v1580_v20 = vld [vmem:[%s1731_s2] ss:$0 sm:$0xff]  ;;  %v1269_v21 = vld [vmem:[%s1436_s8 + $0x218] sm:$0xff] }
  0x37   : > { %1281 = vmatmul.msk.f32.gmra.mxu2 %vm206_vm1, %v1255_v22  ;;  %1332 = vmatmul.msk.f32.gmra.mxu3 %vm206_vm1, %v1306_v23  ;;  %v1320_v22 = vld [vmem:[%s1436_s8 + $0x2e0] sm:$0xff] }
  0x39   : > { %1179 = vmatmul.msk.f32.gmra.mxu0 %vm206_vm1, %v184_v24  ;;  %1230 = vmatmul.msk.f32.gmra.mxu1 %vm206_vm1, %v1204_v25 }
  0x3f   : > { %1282 = vmatmul.msk.f32.gmra.mxu2 %vm206_vm1, %v1256_v26  ;;  %1333 = vmatmul.msk.f32.gmra.mxu3 %vm206_vm1, %v1307_v27  ;;  %v198_v26 = vld [vmem:[%s1436_s8 + $0x88] sm:$0xff]  ;;  %v1218_v27 = vld [vmem:[%s1436_s8 + $0x150] sm:$0xff] }
  0x41   : > { %1180 = vmatmul.msk.f32.gmra.mxu0 %vm206_vm1, %v185_v28  ;;  %1231 = vmatmul.msk.f32.gmra.mxu1 %vm206_vm1, %v1205_v29 }
  0x47   : > { %1283 = vmatmul.msk.f32.gmra.mxu2 %vm206_vm1, %v1257_v30  ;;  %1334 = vmatmul.msk.f32.gmra.mxu3 %vm206_vm1, %v1308_v31 }
  0x49   : > { %1181 = vmatmul.msk.f32.gmra.mxu0 %vm206_vm1, %v186_v32  ;;  %1232 = vmatmul.msk.f32.gmra.mxu1 %vm206_vm1, %v1206_v33 }
  0x4f   : > { %1284 = vmatmul.msk.f32.gmra.mxu2 %vm206_vm1, %v1258_v34  ;;  %1335 = vmatmul.msk.f32.gmra.mxu3 %vm206_vm1, %v1309_v35  ;;  %v1270_v34 = vld [vmem:[%s1436_s8 + $0x220] sm:$0xff]  ;;  %v1321_v35 = vld [vmem:[%s1436_s8 + $0x2e8] sm:$0xff] }
  0x51   : > { %1182 = vmatmul.msk.f32.gmra.mxu0 %vm206_vm1, %v187_v36  ;;  %1233 = vmatmul.msk.f32.gmra.mxu1 %vm206_vm1, %v1207_v37 }
  0x57   : > { %1285 = vmatmul.msk.f32.gmra.mxu2 %vm206_vm1, %v1259_v38  ;;  %1336 = vmatmul.msk.f32.gmra.mxu3 %vm206_vm1, %v1310_v39  ;;  %v199_v39 = vld [vmem:[%s1436_s8 + $0x90] sm:$0xff] }
  0x59   : > { %1183 = vmatmul.msk.f32.gmra.mxu0 %vm206_vm1, %v188_v40  ;;  %1234 = vmatmul.msk.f32.gmra.mxu1 %vm206_vm1, %v1208_v41  ;;  %v1219_v40 = vld [vmem:[%s1436_s8 + $0x158] sm:$0xff] }
  0x5f   : > { %1286 = vmatmul.msk.f32.gmra.mxu2 %vm206_vm1, %v1260_v42  ;;  %1337 = vmatmul.msk.f32.gmra.mxu3 %vm206_vm1, %v1311_v43 }
  0x61   : > { %1184 = vmatmul.msk.f32.gmra.mxu0 %vm206_vm1, %v189_v44  ;;  %1235 = vmatmul.msk.f32.gmra.mxu1 %vm206_vm1, %v1209_v45 }
  0x67   : > { %1287 = vmatmul.msk.f32.gmra.mxu2 %vm206_vm1, %v1261_v46  ;;  %1338 = vmatmul.msk.f32.gmra.mxu3 %vm206_vm1, %v1312_v47  ;;  %v1271_v47 = vld [vmem:[%s1436_s8 + $0x228] sm:$0xff] }
  0x69   : > { %1185 = vmatmul.msk.f32.gmra.mxu0 %vm206_vm1, %v190_v48  ;;  %1236 = vmatmul.msk.f32.gmra.mxu1 %vm206_vm1, %v1210_v49  ;;  %v1322_v48 = vld [vmem:[%s1436_s8 + $0x2f0] sm:$0xff] }
  0x6f   : > { %1288 = vmatmul.msk.f32.gmra.mxu2 %vm206_vm1, %v1262_v50  ;;  %1339 = vmatmul.msk.f32.gmra.mxu3 %vm206_vm1, %v1313_v51 }
  0x71   : > { %1186 = vmatmul.msk.f32.gmra.mxu0 %vm206_vm1, %v191_v52  ;;  %1237 = vmatmul.msk.f32.gmra.mxu1 %vm206_vm1, %v1211_v53  ;;  %v200_v52 = vld [vmem:[%s1436_s8 + $0x98] sm:$0xff]  ;;  %v1220_v53 = vld [vmem:[%s1436_s8 + $0x160] sm:$0xff] }
  0x77   : > { %1289 = vmatmul.msk.f32.gmra.mxu2 %vm206_vm1, %v1263_v54  ;;  %1340 = vmatmul.msk.f32.gmra.mxu3 %vm206_vm1, %v1314_v55 }
  0x79   : > { %1187 = vmatmul.msk.f32.gmra.mxu0 %vm206_vm1, %v192_v56  ;;  %1238 = vmatmul.msk.f32.gmra.mxu1 %vm206_vm1, %v1212_v57 }
  0x7f   : > { %1290 = vmatmul.msk.f32.gmra.mxu2 %vm206_vm1, %v1264_v58  ;;  %1341 = vmatmul.msk.f32.gmra.mxu3 %vm206_vm1, %v1315_v59 }
  0x81   : > { %1188 = vmatmul.msk.f32.gmra.mxu0 %vm206_vm1, %v193_v60  ;;  %1239 = vmatmul.msk.f32.gmra.mxu1 %vm206_vm1, %v1213_v61  ;;  %v1272_v60 = vld [vmem:[%s1436_s8 + $0x230] sm:$0xff]  ;;  %v1323_v61 = vld [vmem:[%s1436_s8 + $0x2f8] sm:$0xff] }
  0x87   : > { %1291 = vmatmul.msk.f32.gmra.mxu2 %vm206_vm1, %v1265_v62  ;;  %1342 = vmatmul.msk.f32.gmra.mxu3 %vm206_vm1, %v1316_v63 }
  0x89   : > { %1189 = vmatmul.msk.f32.gmra.mxu0 %vm206_vm1, %v194_v0  ;;  %1240 = vmatmul.msk.f32.gmra.mxu1 %vm206_vm1, %v1214_v1  ;;  %v201_v1 = vld [vmem:[%s1436_s8 + $0xa0] sm:$0xff] }
  0x8f   : > { %1292 = vmatmul.msk.f32.gmra.mxu2 %vm206_vm1, %v1266_v2  ;;  %1343 = vmatmul.msk.f32.gmra.mxu3 %vm206_vm1, %v1317_v3  ;;  %v1221_v2 = vld [vmem:[%s1436_s8 + $0x168] sm:$0xff] }
  0x91   : > { %1190 = vmatmul.msk.f32.gmra.mxu0 %vm206_vm1, %v195_v4  ;;  %1241 = vmatmul.msk.f32.gmra.mxu1 %vm206_vm1, %v1215_v5 }
  0x97   : > { %1293 = vmatmul.msk.f32.gmra.mxu2 %vm206_vm1, %v1267_v6  ;;  %1344 = vmatmul.msk.f32.gmra.mxu3 %vm206_vm1, %v1318_v7 }
  0x99   : > { %1191 = vmatmul.msk.f32.gmra.mxu0 %vm206_vm1, %v196_v8  ;;  %1242 = vmatmul.msk.f32.gmra.mxu1 %vm206_vm1, %v1216_v9  ;;  %v1273_v9 = vld [vmem:[%s1436_s8 + $0x238] sm:$0xff] }
  0x9e   : > { %v303_v12 = vpop.f32.mrf.mxu0  ;;  %v496_v13 = vpop.f32.mrf.mxu1 }
  0x9f   : > { %1294 = vmatmul.msk.f32.gmra.mxu2 %vm206_vm1, %v1268_v10  ;;  %v571_v16 = vmax.f32 %v303_v12, %v496_v13  ;;  %1345 = vmatmul.msk.f32.gmra.mxu3 %vm206_vm1, %v1319_v11  ;;  %v1324_v10 = vld [vmem:[%s1436_s8 + $0x300] sm:$0xff] }
  0xa1   : > { %1192 = vmatmul.msk.f32.gmra.mxu0 %vm206_vm1, %v197_v14  ;;  %1243 = vmatmul.msk.f32.gmra.mxu1 %vm206_vm1, %v1217_v15  ;;  %v202_v14 = vld [vmem:[%s1436_s8 + $0xa8] sm:$0xff]  ;;  %v1222_v15 = vld [vmem:[%s1436_s8 + $0x170] sm:$0xff] }
  0xa2   : > { %v714_v17 = vpop.f32.mrf.mxu2  ;;  %v932_v18 = vpop.f32.mrf.mxu3 }
  0xa3   : > { %v789_v19 = vmax.f32 %v571_v16, %v714_v17 }
  0xa5   : > { %v1007_v23 = vmax.f32 %v789_v19, %v932_v18 }
  0xa6   : > { %v306_v24 = vpop.f32.mrf.mxu0  ;;  %v499_v25 = vpop.f32.mrf.mxu1 }
  0xa7   : > { %v1036_v28 = vadd.f32 %v1580_v20, %v1007_v23  ;;  %1295 = vmatmul.msk.f32.gmra.mxu2 %vm206_vm1, %v1269_v21  ;;  %v572_v29 = vmax.f32 %v306_v24, %v499_v25  ;;  %1346 = vmatmul.msk.f32.gmra.mxu3 %vm206_vm1, %v1320_v22  ;;  %v1274_v23 = vld [vmem:[%s1436_s8 + $0x240] sm:$0xff]  ;;  %v1325_v24 = vld [vmem:[%s1436_s8 + $0x308] sm:$0xff] }
  0xa9   : > { %v1061_v30 = vmax.f32 %v1036_v28, 0.0  ;;  %1193 = vmatmul.msk.f32.gmra.mxu0 %vm206_vm1, %v198_v26  ;;  %1244 = vmatmul.msk.f32.gmra.mxu1 %vm206_vm1, %v1218_v27  ;;  %v203_v28 = vld [vmem:[%s1436_s8 + $0xb0] sm:$0xff] }
  0xaa   : > { %v717_v31 = vpop.f32.mrf.mxu2  ;;  %v935_v32 = vpop.f32.mrf.mxu3 }
  0xab   : > { %1087 = vst.msk [vmem:[%s1593_s13] sm:$0xff] %vm1086_vm2, %v1061_v30  ;;  %v790_v33 = vmax.f32 %v572_v29, %v717_v31  ;;  %v1223_v29 = vld [vmem:[%s1436_s8 + $0x178] sm:$0xff] }
  0xad   : > { %v1008_v36 = vmax.f32 %v790_v33, %v935_v32 }
  0xae   : > { %v309_v37 = vpop.f32.mrf.mxu0  ;;  %v502_v38 = vpop.f32.mrf.mxu1 }
  0xaf   : > { %v1037_v41 = vadd.f32 %v1580_v20, %v1008_v36  ;;  %1296 = vmatmul.msk.f32.gmra.mxu2 %vm206_vm1, %v1270_v34  ;;  %v573_v42 = vmax.f32 %v309_v37, %v502_v38  ;;  %1347 = vmatmul.msk.f32.gmra.mxu3 %vm206_vm1, %v1321_v35  ;;  %v1275_v36 = vld [vmem:[%s1436_s8 + $0x248] sm:$0xff]  ;;  %v1326_v37 = vld [vmem:[%s1436_s8 + $0x310] sm:$0xff] }
  0xb1   : > { %v1062_v43 = vmax.f32 %v1037_v41, 0.0  ;;  %1194 = vmatmul.msk.f32.gmra.mxu0 %vm206_vm1, %v199_v39  ;;  %1245 = vmatmul.msk.f32.gmra.mxu1 %vm206_vm1, %v1219_v40  ;;  %v204_v41 = vld [vmem:[%s1436_s8 + $0xb8] sm:$0xff] }
  0xb2   : > { %v720_v44 = vpop.f32.mrf.mxu2  ;;  %v938_v45 = vpop.f32.mrf.mxu3 }
  0xb3   : > { %1088 = vst.msk [vmem:[%s1593_s13 + $0x8] sm:$0xff] %vm1086_vm2, %v1062_v43  ;;  %v791_v46 = vmax.f32 %v573_v42, %v720_v44  ;;  %v1224_v42 = vld [vmem:[%s1436_s8 + $0x180] sm:$0xff] }
  0xb5   : > { %v1009_v49 = vmax.f32 %v791_v46, %v938_v45 }
  0xb6   : > { %v312_v50 = vpop.f32.mrf.mxu0  ;;  %v505_v51 = vpop.f32.mrf.mxu1 }
  0xb7   : > { %v1038_v54 = vadd.f32 %v1580_v20, %v1009_v49  ;;  %1297 = vmatmul.msk.f32.gmra.mxu2 %vm206_vm1, %v1271_v47  ;;  %v574_v55 = vmax.f32 %v312_v50, %v505_v51  ;;  %1348 = vmatmul.msk.f32.gmra.mxu3 %vm206_vm1, %v1322_v48  ;;  %v1276_v49 = vld [vmem:[%s1436_s8 + $0x250] sm:$0xf]  ;;  %v1327_v50 = vld [vmem:[%s1436_s8 + $0x318] sm:$0xf] }
  0xb9   : > { %v1063_v56 = vmax.f32 %v1038_v54, 0.0  ;;  %1195 = vmatmul.msk.f32.gmra.mxu0 %vm206_vm1, %v200_v52  ;;  %1246 = vmatmul.msk.f32.gmra.mxu1 %vm206_vm1, %v1220_v53  ;;  %v205_v54 = vld [vmem:[%s1436_s8 + $0xc0] sm:$0xf] }
  0xba   : > { %v723_v57 = vpop.f32.mrf.mxu2  ;;  %v941_v58 = vpop.f32.mrf.mxu3 }
  0xbb   : > { %1089 = vst.msk [vmem:[%s1593_s13 + $0x10] sm:$0xff] %vm1086_vm2, %v1063_v56  ;;  %v792_v59 = vmax.f32 %v574_v55, %v723_v57  ;;  %v1225_v55 = vld [vmem:[%s1436_s8 + $0x188] sm:$0xf] }
  0xbd   : > { %v1010_v62 = vmax.f32 %v792_v59, %v941_v58 }
  0xbe   : > { %v315_v63 = vpop.f32.mrf.mxu0  ;;  %v508_v0 = vpop.f32.mrf.mxu1 }
  0xbf   : > { %v1039_v3 = vadd.f32 %v1580_v20, %v1010_v62  ;;  %1298 = vmatmul.msk.f32.gmra.mxu2 %vm206_vm1, %v1272_v60  ;;  %v575_v4 = vmax.f32 %v315_v63, %v508_v0  ;;  %1349 = vmatmul.msk.f32.gmra.mxu3 %vm206_vm1, %v1323_v61 }
  0xc1   : > { %v1064_v5 = vmax.f32 %v1039_v3, 0.0  ;;  %1196 = vmatmul.msk.f32.gmra.mxu0 %vm206_vm1, %v201_v1  ;;  %1247 = vmatmul.msk.f32.gmra.mxu1 %vm206_vm1, %v1221_v2 }
  0xc2   : > { %v726_v6 = vpop.f32.mrf.mxu2  ;;  %v944_v7 = vpop.f32.mrf.mxu3 }
  0xc3   : > { %1090 = vst.msk [vmem:[%s1593_s13 + $0x18] sm:$0xff] %vm1086_vm2, %v1064_v5  ;;  %v793_v8 = vmax.f32 %v575_v4, %v726_v6 }
  0xc5   : > { %v1011_v11 = vmax.f32 %v793_v8, %v944_v7 }
  0xc6   : > { %v318_v12 = vpop.f32.mrf.mxu0  ;;  %v511_v13 = vpop.f32.mrf.mxu1 }
  0xc7   : > { %v1040_v16 = vadd.f32 %v1580_v20, %v1011_v11  ;;  %1299 = vmatmul.msk.f32.gmra.mxu2 %vm206_vm1, %v1273_v9  ;;  %v576_v17 = vmax.f32 %v318_v12, %v511_v13  ;;  %1350 = vmatmul.msk.f32.gmra.mxu3 %vm206_vm1, %v1324_v10 }
  0xc9   : > { %v1065_v18 = vmax.f32 %v1040_v16, 0.0  ;;  %1197 = vmatmul.msk.f32.gmra.mxu0 %vm206_vm1, %v202_v14  ;;  %1248 = vmatmul.msk.f32.gmra.mxu1 %vm206_vm1, %v1222_v15 }
  0xca   : > { %v729_v19 = vpop.f32.mrf.mxu2  ;;  %v947_v21 = vpop.f32.mrf.mxu3 }
  0xcb   : > { %1091 = vst.msk [vmem:[%s1593_s13 + $0x20] sm:$0xff] %vm1086_vm2, %v1065_v18  ;;  %v794_v22 = vmax.f32 %v576_v17, %v729_v19 }
  0xcd   : > { %v1012_v25 = vmax.f32 %v794_v22, %v947_v21 }
  0xce   : > { %v321_v26 = vpop.f32.mrf.mxu0  ;;  %v514_v27 = vpop.f32.mrf.mxu1 }
  0xcf   : > { %v1041_v30 = vadd.f32 %v1580_v20, %v1012_v25  ;;  %1300 = vmatmul.msk.f32.gmra.mxu2 %vm206_vm1, %v1274_v23  ;;  %v577_v31 = vmax.f32 %v321_v26, %v514_v27  ;;  %1351 = vmatmul.msk.f32.gmra.mxu3 %vm206_vm1, %v1325_v24 }
  0xd1   : > { %v1066_v32 = vmax.f32 %v1041_v30, 0.0  ;;  %1198 = vmatmul.msk.f32.gmra.mxu0 %vm206_vm1, %v203_v28  ;;  %1249 = vmatmul.msk.f32.gmra.mxu1 %vm206_vm1, %v1223_v29 }
  0xd2   : > { %v732_v33 = vpop.f32.mrf.mxu2  ;;  %v950_v34 = vpop.f32.mrf.mxu3 }
  0xd3   : > { %1092 = vst.msk [vmem:[%s1593_s13 + $0x28] sm:$0xff] %vm1086_vm2, %v1066_v32  ;;  %v795_v35 = vmax.f32 %v577_v31, %v732_v33 }
  0xd5   : > { %v1013_v38 = vmax.f32 %v795_v35, %v950_v34 }
  0xd6   : > { %v324_v39 = vpop.f32.mrf.mxu0  ;;  %v517_v40 = vpop.f32.mrf.mxu1 }
  0xd7   : > { %v1042_v43 = vadd.f32 %v1580_v20, %v1013_v38  ;;  %1301 = vmatmul.msk.f32.gmra.mxu2 %vm206_vm1, %v1275_v36  ;;  %v578_v44 = vmax.f32 %v324_v39, %v517_v40  ;;  %1352 = vmatmul.msk.f32.gmra.mxu3 %vm206_vm1, %v1326_v37 }
  0xd9   : > { %v1067_v45 = vmax.f32 %v1042_v43, 0.0  ;;  %1199 = vmatmul.msk.f32.gmra.mxu0 %vm206_vm1, %v204_v41  ;;  %1250 = vmatmul.msk.f32.gmra.mxu1 %vm206_vm1, %v1224_v42 }
  0xda   : > { %v735_v46 = vpop.f32.mrf.mxu2  ;;  %v953_v47 = vpop.f32.mrf.mxu3 }
  0xdb   : > { %1093 = vst.msk [vmem:[%s1593_s13 + $0x30] sm:$0xff] %vm1086_vm2, %v1067_v45  ;;  %v796_v48 = vmax.f32 %v578_v44, %v735_v46 }
  0xdd   : > { %v1014_v51 = vmax.f32 %v796_v48, %v953_v47 }
  0xde   : > { %v327_v52 = vpop.f32.mrf.mxu0  ;;  %v520_v53 = vpop.f32.mrf.mxu1 }
  0xdf   : > { %v1043_v56 = vadd.f32 %v1580_v20, %v1014_v51  ;;  %1302 = vmatmul.msk.f32.gmra.mxu2 %vm206_vm1, %v1276_v49  ;;  %v579_v57 = vmax.f32 %v327_v52, %v520_v53  ;;  %1353 = vmatmul.msk.f32.gmra.mxu3 %vm206_vm1, %v1327_v50 }
  0xe1   : > { %v1068_v58 = vmax.f32 %v1043_v56, 0.0  ;;  %1200 = vmatmul.msk.f32.gmra.mxu0 %vm206_vm1, %v205_v54  ;;  %1251 = vmatmul.msk.f32.gmra.mxu1 %vm206_vm1, %v1225_v55 }
  0xe2   : > { %v738_v59 = vpop.f32.mrf.mxu2  ;;  %v956_v60 = vpop.f32.mrf.mxu3 }
  0xe3   : > { %1094 = vst.msk [vmem:[%s1593_s13 + $0x38] sm:$0xff] %vm1086_vm2, %v1068_v58  ;;  %v797_v61 = vmax.f32 %v579_v57, %v738_v59 }
  0xe5   : > { %v1015_v62 = vmax.f32 %v797_v61, %v956_v60 }
  0xe6   : > { %v330_v63 = vpop.f32.mrf.mxu0  ;;  %v523_v0 = vpop.f32.mrf.mxu1 }
  0xe7   : > { %v1044_v1 = vadd.f32 %v1580_v20, %v1015_v62  ;;  %v580_v2 = vmax.f32 %v330_v63, %v523_v0 }
  0xe9   : > { %v1069_v3 = vmax.f32 %v1044_v1, 0.0 }
  0xea   : > { %v741_v4 = vpop.f32.mrf.mxu2  ;;  %v959_v5 = vpop.f32.mrf.mxu3 }
  0xeb   : > { %1095 = vst.msk [vmem:[%s1593_s13 + $0x40] sm:$0xff] %vm1086_vm2, %v1069_v3  ;;  %v798_v6 = vmax.f32 %v580_v2, %v741_v4 }
  0xed   : > { %v1016_v7 = vmax.f32 %v798_v6, %v959_v5 }
  0xee   : > { %v333_v8 = vpop.f32.mrf.mxu0  ;;  %v526_v9 = vpop.f32.mrf.mxu1 }
  0xef   : > { %v1045_v10 = vadd.f32 %v1580_v20, %v1016_v7  ;;  %v581_v11 = vmax.f32 %v333_v8, %v526_v9 }
  0xf1   : > { %v1070_v12 = vmax.f32 %v1045_v10, 0.0 }
  0xf2   : > { %v744_v13 = vpop.f32.mrf.mxu2  ;;  %v962_v14 = vpop.f32.mrf.mxu3 }
  0xf3   : > { %1096 = vst.msk [vmem:[%s1593_s13 + $0x48] sm:$0xff] %vm1086_vm2, %v1070_v12  ;;  %v799_v15 = vmax.f32 %v581_v11, %v744_v13 }
  0xf5   : > { %v1017_v16 = vmax.f32 %v799_v15, %v962_v14 }
  0xf6   : > { %v336_v17 = vpop.f32.mrf.mxu0  ;;  %v529_v18 = vpop.f32.mrf.mxu1 }
  0xf7   : > { %v1046_v19 = vadd.f32 %v1580_v20, %v1017_v16  ;;  %v582_v21 = vmax.f32 %v336_v17, %v529_v18 }
  0xf9   : > { %v1071_v22 = vmax.f32 %v1046_v19, 0.0 }
  0xfa   : > { %v747_v23 = vpop.f32.mrf.mxu2  ;;  %v965_v24 = vpop.f32.mrf.mxu3 }
  0xfb   : > { %1097 = vst.msk [vmem:[%s1593_s13 + $0x50] sm:$0xff] %vm1086_vm2, %v1071_v22  ;;  %v800_v25 = vmax.f32 %v582_v21, %v747_v23 }
  0xfd   : > { %v1018_v26 = vmax.f32 %v800_v25, %v965_v24 }
  0xfe   : > { %v339_v27 = vpop.f32.mrf.mxu0  ;;  %v532_v28 = vpop.f32.mrf.mxu1 }
  0xff   : > { %v1047_v29 = vadd.f32 %v1580_v20, %v1018_v26  ;;  %v583_v30 = vmax.f32 %v339_v27, %v532_v28 }
 0x101   : > { %v1072_v31 = vmax.f32 %v1047_v29, 0.0 }
 0x102   : > { %v750_v32 = vpop.f32.mrf.mxu2  ;;  %v968_v33 = vpop.f32.mrf.mxu3 }
 0x103   : > { %1098 = vst.msk [vmem:[%s1593_s13 + $0x58] sm:$0xff] %vm1086_vm2, %v1072_v31  ;;  %v801_v34 = vmax.f32 %v583_v30, %v750_v32 }
 0x105   : > { %v1019_v35 = vmax.f32 %v801_v34, %v968_v33 }
 0x106   : > { %v342_v36 = vpop.f32.mrf.mxu0  ;;  %v535_v37 = vpop.f32.mrf.mxu1 }
 0x107   : > { %v1048_v38 = vadd.f32 %v1580_v20, %v1019_v35  ;;  %v584_v39 = vmax.f32 %v342_v36, %v535_v37 }
 0x109   : > { %v1073_v40 = vmax.f32 %v1048_v38, 0.0 }
 0x10a   : > { %v753_v41 = vpop.f32.mrf.mxu2  ;;  %v971_v42 = vpop.f32.mrf.mxu3 }
 0x10b   : > { %1099 = vst.msk [vmem:[%s1593_s13 + $0x60] sm:$0xff] %vm1086_vm2, %v1073_v40  ;;  %v802_v43 = vmax.f32 %v584_v39, %v753_v41 }
 0x10d   : > { %v1020_v44 = vmax.f32 %v802_v43, %v971_v42 }
 0x10e   : > { %v345_v45 = vpop.f32.mrf.mxu0  ;;  %v538_v46 = vpop.f32.mrf.mxu1 }
 0x10f   : > { %v1049_v47 = vadd.f32 %v1580_v20, %v1020_v44  ;;  %v585_v48 = vmax.f32 %v345_v45, %v538_v46 }
 0x111   : > { %v1074_v49 = vmax.f32 %v1049_v47, 0.0 }
 0x112   : > { %v756_v50 = vpop.f32.mrf.mxu2  ;;  %v974_v51 = vpop.f32.mrf.mxu3 }
 0x113   : > { %1100 = vst.msk [vmem:[%s1593_s13 + $0x68] sm:$0xff] %vm1086_vm2, %v1074_v49  ;;  %v803_v52 = vmax.f32 %v585_v48, %v756_v50 }
 0x115   : > { %v1021_v53 = vmax.f32 %v803_v52, %v974_v51 }
 0x116   : > { %v348_v54 = vpop.f32.mrf.mxu0  ;;  %v541_v55 = vpop.f32.mrf.mxu1 }
 0x117   : > { %v1050_v56 = vadd.f32 %v1580_v20, %v1021_v53  ;;  %v586_v57 = vmax.f32 %v348_v54, %v541_v55 }
 0x119   : > { %v1075_v58 = vmax.f32 %v1050_v56, 0.0 }
 0x11a   : > { %v759_v59 = vpop.f32.mrf.mxu2  ;;  %v977_v60 = vpop.f32.mrf.mxu3 }
 0x11b   : > { %1101 = vst.msk [vmem:[%s1593_s13 + $0x70] sm:$0xff] %vm1086_vm2, %v1075_v58  ;;  %v804_v61 = vmax.f32 %v586_v57, %v759_v59 }
 0x11d   : > { %v1022_v62 = vmax.f32 %v804_v61, %v977_v60 }
 0x11e   : > { %v351_v63 = vpop.f32.mrf.mxu0  ;;  %v544_v0 = vpop.f32.mrf.mxu1 }
 0x11f   : > { %v1051_v1 = vadd.f32 %v1580_v20, %v1022_v62  ;;  %v587_v2 = vmax.f32 %v351_v63, %v544_v0 }
 0x121   : > { %v1076_v3 = vmax.f32 %v1051_v1, 0.0 }
 0x122   : > { %v762_v4 = vpop.f32.mrf.mxu2  ;;  %v980_v5 = vpop.f32.mrf.mxu3 }
 0x123   : > { %1102 = vst.msk [vmem:[%s1593_s13 + $0x78] sm:$0xff] %vm1086_vm2, %v1076_v3  ;;  %v805_v6 = vmax.f32 %v587_v2, %v762_v4 }
 0x125   : > { %v1023_v7 = vmax.f32 %v805_v6, %v980_v5 }
 0x126   : > { %v354_v8 = vpop.f32.mrf.mxu0  ;;  %v547_v9 = vpop.f32.mrf.mxu1 }
 0x127   : > { %v1052_v10 = vadd.f32 %v1580_v20, %v1023_v7  ;;  %v588_v11 = vmax.f32 %v354_v8, %v547_v9 }
 0x129   : > { %v1077_v12 = vmax.f32 %v1052_v10, 0.0 }
 0x12a   : > { %v765_v13 = vpop.f32.mrf.mxu2  ;;  %v983_v14 = vpop.f32.mrf.mxu3 }
 0x12b   : > { %1103 = vst.msk [vmem:[%s1593_s13 + $0x80] sm:$0xff] %vm1086_vm2, %v1077_v12  ;;  %v806_v15 = vmax.f32 %v588_v11, %v765_v13 }
 0x12d   : > { %v1024_v16 = vmax.f32 %v806_v15, %v983_v14 }
 0x12e   : > { %v357_v17 = vpop.f32.mrf.mxu0  ;;  %v550_v18 = vpop.f32.mrf.mxu1 }
 0x12f   : > { %v1053_v19 = vadd.f32 %v1580_v20, %v1024_v16  ;;  %v589_v21 = vmax.f32 %v357_v17, %v550_v18 }
 0x131   : > { %v1078_v22 = vmax.f32 %v1053_v19, 0.0 }
 0x132   : > { %v768_v23 = vpop.f32.mrf.mxu2  ;;  %v986_v24 = vpop.f32.mrf.mxu3 }
 0x133   : > { %1104 = vst.msk [vmem:[%s1593_s13 + $0x88] sm:$0xff] %vm1086_vm2, %v1078_v22  ;;  %v807_v25 = vmax.f32 %v589_v21, %v768_v23 }
 0x135   : > { %v1025_v26 = vmax.f32 %v807_v25, %v986_v24 }
 0x136   : > { %v360_v27 = vpop.f32.mrf.mxu0  ;;  %v553_v28 = vpop.f32.mrf.mxu1 }
 0x137   : > { %v1054_v29 = vadd.f32 %v1580_v20, %v1025_v26  ;;  %v590_v30 = vmax.f32 %v360_v27, %v553_v28 }
 0x139   : > { %v1079_v31 = vmax.f32 %v1054_v29, 0.0 }
 0x13a   : > { %v771_v32 = vpop.f32.mrf.mxu2  ;;  %v989_v33 = vpop.f32.mrf.mxu3 }
 0x13b   : > { %1105 = vst.msk [vmem:[%s1593_s13 + $0x90] sm:$0xff] %vm1086_vm2, %v1079_v31  ;;  %v808_v34 = vmax.f32 %v590_v30, %v771_v32 }
 0x13d   : > { %v1026_v35 = vmax.f32 %v808_v34, %v989_v33 }
 0x13e   : > { %v363_v36 = vpop.f32.mrf.mxu0  ;;  %v556_v37 = vpop.f32.mrf.mxu1 }
 0x13f   : > { %v1055_v38 = vadd.f32 %v1580_v20, %v1026_v35  ;;  %v591_v39 = vmax.f32 %v363_v36, %v556_v37 }
 0x141   : > { %v1080_v40 = vmax.f32 %v1055_v38, 0.0 }
 0x142   : > { %v774_v41 = vpop.f32.mrf.mxu2  ;;  %v992_v42 = vpop.f32.mrf.mxu3 }
 0x143   : > { %1106 = vst.msk [vmem:[%s1593_s13 + $0x98] sm:$0xff] %vm1086_vm2, %v1080_v40  ;;  %v809_v43 = vmax.f32 %v591_v39, %v774_v41 }
 0x145   : > { %v1027_v44 = vmax.f32 %v809_v43, %v992_v42 }
 0x146   : > { %v366_v45 = vpop.f32.mrf.mxu0  ;;  %v559_v46 = vpop.f32.mrf.mxu1 }
 0x147   : > { %v1056_v47 = vadd.f32 %v1580_v20, %v1027_v44  ;;  %v592_v48 = vmax.f32 %v366_v45, %v559_v46 }
 0x149   : > { %v1081_v49 = vmax.f32 %v1056_v47, 0.0 }
 0x14a   : > { %v777_v50 = vpop.f32.mrf.mxu2  ;;  %v995_v51 = vpop.f32.mrf.mxu3 }
 0x14b   : > { %1107 = vst.msk [vmem:[%s1593_s13 + $0xa0] sm:$0xff] %vm1086_vm2, %v1081_v49  ;;  %v810_v52 = vmax.f32 %v592_v48, %v777_v50 }
 0x14d   : > { %v1028_v53 = vmax.f32 %v810_v52, %v995_v51 }
 0x14e   : > { %v369_v54 = vpop.f32.mrf.mxu0  ;;  %v562_v55 = vpop.f32.mrf.mxu1 }
 0x14f   : > { %v1057_v56 = vadd.f32 %v1580_v20, %v1028_v53  ;;  %v593_v57 = vmax.f32 %v369_v54, %v562_v55 }
 0x151   : > { %v1082_v58 = vmax.f32 %v1057_v56, 0.0 }
 0x152   : > { %v780_v59 = vpop.f32.mrf.mxu2  ;;  %v998_v60 = vpop.f32.mrf.mxu3 }
 0x153   : > { %1108 = vst.msk [vmem:[%s1593_s13 + $0xa8] sm:$0xff] %vm1086_vm2, %v1082_v58  ;;  %v811_v61 = vmax.f32 %v593_v57, %v780_v59 }
 0x155   : > { %v1029_v62 = vmax.f32 %v811_v61, %v998_v60 }
 0x156   : > { %v372_v63 = vpop.f32.mrf.mxu0  ;;  %v565_v0 = vpop.f32.mrf.mxu1 }
 0x157   : > { %v1058_v1 = vadd.f32 %v1580_v20, %v1029_v62  ;;  %v594_v2 = vmax.f32 %v372_v63, %v565_v0 }
 0x159   : > { %v1083_v3 = vmax.f32 %v1058_v1, 0.0 }
 0x15a   : > { %v783_v4 = vpop.f32.mrf.mxu2  ;;  %v1001_v5 = vpop.f32.mrf.mxu3 }
 0x15b   : > { %1109 = vst.msk [vmem:[%s1593_s13 + $0xb0] sm:$0xff] %vm1086_vm2, %v1083_v3  ;;  %v812_v6 = vmax.f32 %v594_v2, %v783_v4 }
 0x15d   : > { %v1030_v7 = vmax.f32 %v812_v6, %v1001_v5 }
 0x15e   : > { %v375_v8 = vpop.f32.mrf.mxu0  ;;  %v568_v9 = vpop.f32.mrf.mxu1 }
 0x15f   : > { %v1059_v10 = vadd.f32 %v1580_v20, %v1030_v7  ;;  %v595_v11 = vmax.f32 %v375_v8, %v568_v9 }
 0x161   : > { %v1084_v12 = vmax.f32 %v1059_v10, 0.0 }
 0x162   : > { %v786_v13 = vpop.f32.mrf.mxu2  ;;  %v1004_v14 = vpop.f32.mrf.mxu3 }
 0x163   : > { %1110 = vst.msk [vmem:[%s1593_s13 + $0xb8] sm:$0xff] %vm1086_vm2, %v1084_v12  ;;  %v813_v15 = vmax.f32 %v595_v11, %v786_v13 }
 0x165   : > { %v1031_v16 = vmax.f32 %v813_v15, %v1004_v14 }
 0x167   : > { %v1060_v17 = vadd.f32 %v1580_v20, %v1031_v16 }
 0x169   : > { %v1085_v18 = vmax.f32 %v1060_v17, 0.0 }
 0x16b   : > { %1112 = vst.msk [vmem:[%s1593_s13 + $0xc0] sm:$0xf] %vm1111_vm3, %v1085_v18 }
 0x16c PF: > { %s13_s12 = sadd.s32 1, %s1373_s12  }
 0x16d   : > { %p10_p4 = scmp.ge.s32.totalorder %s13_s12, 4  }
 0x16f   :  { %12 = sbr.rel (!%p10_p4) target bundleno = 1 (0x1), region = 65 }

// kernel: lenet5_forward.4
= control target key start
LH: loop header
LB: loop body
LE: loop exit
PB: predicated region body
PF: predicated region fallthrough
CT: control target
= control target key end

     0   :  { %s708_s12 = smov 0   ;;  %s986_s0 = inlined_call_operand.vmem [shape: f32[2,4,25,150], index: 0, kind: input, shape index: {}]   ;;  %s987_s1 = inlined_call_operand.vmem [shape: f32[150,16], index: 1, kind: input, shape index: {}]   ;;  %s988_s2 = inlined_call_operand.vmem [shape: f32[1,16], index: 2, kind: input, shape index: {}]   ;;  %s989_s3 = inlined_call_operand.vmem [shape: f32[2,25,16], index: 3, kind: output, shape index: {}]  }
   0x1 LB: > { %s595_s13 = sadd.s32 4294967295, %s686_s12   ;;  %p599_p0 = scmp.ge.s32.totalorder %s686_s12, 1  ;;  %s686_s12 = sphi %s708_s12, %s13_s12  }
   0x2   : > { %p137_p1 = scmp.lt.s32.totalorder %s686_s12, 3 }
   0x4   : > { %p138_p2 = pnand %p599_p0, %p137_p1 }
   0x5   : > { %p161_p3 = scmp.lt.s32.totalorder (!%p138_p2), %s595_s13, 1 }
   0x6   : > { %141 = sbr.rel (%p138_p2) target bundleno = 233 (0xe9), region = 32 }
   0xb   : > { %v719_v0 = vld [vmem:[%s987_s1 + $0x78] sm:$0xff]  ;;  %v724_v1 = vld [vmem:[%s987_s1 + $0x90] sm:$0x3f]  ;;  %vm211_vm0 = vcmask 1045504   ;;  %v736_v3 = vld [vmem:[%s987_s1 + $0x88] sm:$0xff]  ;;  %s991_s13 = smov (!%p161_p3, %s595_s13), 1 }
   0xc   : > { %v729_v2 = vld [vmem:[%s987_s1 + $0x70] sm:$0xff]  ;;  %215 = vmatpush.msra.mxu0 %v719_v0  ;;  %294 = vmatpush.msra.mxu2 %v719_v0  ;;  %v743_v4 = vld [vmem:[%s987_s1 + $0x68] sm:$0xff]  ;;  %v754_v5 = vld [vmem:[%s987_s1 + $0x80] sm:$0xff]  ;;  %s650_s28 = sshll.u32 %s991_s13, 8  ;;  %vm198_vm1 = vcmask 179200   ;;  %s651_s6 = sshll.u32 %s991_s13, 5 }
   0xd   : > { %617 = vmatpush.msk.msra.mxu3 %vm211_vm0, %v724_v1  ;;  %604 = vmatpush.msk.msra.mxu1 %vm211_vm0, %v724_v1  ;;  %v760_v6 = vld [vmem:[%s987_s1 + $0x60] sm:$0xff]  ;;  %s769_s4 = scalar_lea.vmem %s986_s0, %s650_s28  ;;  %v776_v8 = vld [vmem:[%s987_s1 + $0x58] sm:$0xff]  ;;  %v786_v10 = vld [vmem:[%s987_s1 + $0x50] sm:$0xff]  ;;  %s974_s9 = scalar_lea.vmem %s989_s3, %s651_s6  ;;  %vm534_vm2 = vcmask 130048   ;;  %vm538_vm3 = vcmask 122880  }
   0xe   : > { %216 = vmatpush.msra.mxu0 %v729_v2  ;;  %295 = vmatpush.msra.mxu2 %v729_v2  ;;  %v610_v7 = vld [vmem:[%s769_s4 + $0x48] sm:$0xff]  ;;  %v804_v12 = vld [vmem:[%s987_s1 + $0x40] sm:$0xff]  ;;  %v612_v13 = vld [vmem:[%s769_s4 + $0x58] sm:$0xff] }
   0xf   : > { %337 = vmatpush.msra.mxu3 %v736_v3  ;;  %258 = vmatpush.msra.mxu1 %v736_v3  ;;  %v191_v9 = vld [vmem:[%s769_s4 + $0x8] sm:$0xff]  ;;  %v814_v14 = vld [vmem:[%s987_s1 + $0x38] sm:$0xff]  ;;  %v825_v16 = vld [vmem:[%s987_s1 + $0x30] sm:$0xff] }
  0x10   : > { %217 = vmatpush.msra.mxu0 %v743_v4  ;;  %296 = vmatpush.msra.mxu2 %v743_v4  ;;  %v794_v11 = vld [vmem:[%s987_s1 + $0x48] sm:$0xff]  ;;  %v193_v15 = vld [vmem:[%s769_s4 + $0x18] sm:$0xff]  ;;  %v844_v18 = vld [vmem:[%s987_s1 + $0x20] sm:$0xff] }
  0x11   : > { %338 = vmatpush.msra.mxu3 %v754_v5  ;;  %259 = vmatpush.msra.mxu1 %v754_v5  ;;  %v833_v17 = vld [vmem:[%s987_s1 + $0x28] sm:$0xff]  ;;  %v854_v20 = vld [vmem:[%s987_s1 + $0x18] sm:$0xff]  ;;  %v864_v21 = vld [vmem:[%s987_s1 + $0x10] sm:$0xff] }
  0x12   : > { %218 = vmatpush.msra.mxu0 %v760_v6  ;;  %297 = vmatpush.msra.mxu2 %v760_v6  ;;  %v614_v19 = vld [vmem:[%s769_s4 + $0x68] sm:$0xff]  ;;  %v881_v24 = vld [vmem:[%s987_s1] sm:$0xff]  ;;  %v616_v25 = vld [vmem:[%s769_s4 + $0x78] sm:$0x1] }
  0x13   : > { %618 = vmatmul.msk.f32.vlgmr.msra.gmra.mxu3 %vm198_vm1, %v610_v7  ;;  %605 = vmatmul.msk.f32.vlgmr.msra.gmra.mxu1 %vm198_vm1, %v191_v9  ;;  %v195_v22 = vld [vmem:[%s769_s4 + $0x28] sm:$0xff]  ;;  %v190_v26 = vld [vmem:[%s769_s4] sm:$0xff]  ;;  %v197_v28 = vld [vmem:[%s769_s4 + $0x38] sm:$0x1] }
  0x14   : > { %219 = vmatpush.msra.mxu0 %v776_v8  ;;  %298 = vmatpush.msra.mxu2 %v776_v8  ;;  %v873_v23 = vld [vmem:[%s987_s1 + $0x8] sm:$0xff]  ;;  %v609_v27 = vld [vmem:[%s769_s4 + $0x40] sm:$0xff]  ;;  %v192_v30 = vld [vmem:[%s769_s4 + $0x10] sm:$0xff] }
  0x15   : > { %377 = vmatpush.msrb.mxu1 %v719_v0  ;;  %630 = vmatpush.msk.msrb.mxu3 %vm211_vm0, %v724_v1  ;;  %v623_v29 = vld [vmem:[%s769_s4 + $0x88] sm:$0xff]  ;;  %v611_v31 = vld [vmem:[%s769_s4 + $0x50] sm:$0xff]  ;;  %v622_v32 = vld [vmem:[%s769_s4 + $0x80] sm:$0xff] }
  0x16   : > { %220 = vmatpush.msra.mxu0 %v786_v10  ;;  %299 = vmatpush.msra.mxu2 %v786_v10  ;;  %v625_v33 = vld [vmem:[%s769_s4 + $0x98] sm:$0xff]  ;;  %v194_v34 = vld [vmem:[%s769_s4 + $0x20] sm:$0xff]  ;;  %v624_v36 = vld [vmem:[%s769_s4 + $0x90] sm:$0xff] }
  0x17   : > { %378 = vmatpush.msrb.mxu1 %v729_v2  ;;  %420 = vmatpush.msrb.mxu3 %v736_v3  ;;  %v613_v35 = vld [vmem:[%s769_s4 + $0x60] sm:$0xff]  ;;  %v627_v37 = vld [vmem:[%s769_s4 + $0xa8] sm:$0xff]  ;;  %v196_v38 = vld [vmem:[%s769_s4 + $0x30] sm:$0x1] }
  0x18   : > { %221 = vmatpush.msra.mxu0 %v794_v11  ;;  %300 = vmatpush.msra.mxu2 %v794_v11  ;;  %v615_v39 = vld [vmem:[%s769_s4 + $0x70] sm:$0x1]  ;;  %v626_v40 = vld [vmem:[%s769_s4 + $0xa0] sm:$0xff]  ;;  %v629_v41 = vld [vmem:[%s769_s4 + $0xb8] sm:$0x1] }
  0x19   : > { %379 = vmatpush.msrb.mxu1 %v743_v4  ;;  %421 = vmatpush.msrb.mxu3 %v754_v5  ;;  %v636_v42 = vld [vmem:[%s769_s4 + $0xc8] sm:$0xff]  ;;  %v628_v43 = vld [vmem:[%s769_s4 + $0xb0] sm:$0x1]  ;;  %v635_v44 = vld [vmem:[%s769_s4 + $0xc0] sm:$0xff] }
  0x1a   : > { %222 = vmatpush.msra.mxu0 %v804_v12  ;;  %301 = vmatpush.msra.mxu2 %v804_v12  ;;  %v642_v45 = vld [vmem:[%s769_s4 + $0xf8] sm:$0x1]  ;;  %v641_v47 = vld [vmem:[%s769_s4 + $0xf0] sm:$0x1]  ;;  %v640_v49 = vld [vmem:[%s769_s4 + $0xe8] sm:$0xff] }
  0x1b   : > { %619 = vmatmul.msk.f32.gmra.mxu3 %vm198_vm1, %v612_v13  ;;  %380 = vmatpush.msrb.mxu1 %v760_v6  ;;  %v638_v46 = vld [vmem:[%s769_s4 + $0xd8] sm:$0xff]  ;;  %v637_v48 = vld [vmem:[%s769_s4 + $0xd0] sm:$0xff]  ;;  %v639_v50 = vld [vmem:[%s769_s4 + $0xe0] sm:$0xff] }
  0x1c   : > { %223 = vmatpush.msra.mxu0 %v814_v14  ;;  %302 = vmatpush.msra.mxu2 %v814_v14 }
  0x1d   : > { %606 = vmatmul.msk.f32.gmra.mxu1 %vm198_vm1, %v193_v15  ;;  %668 = vmatpush.msk.msra.mxu3 %vm211_vm0, %v724_v1 }
  0x1e   : > { %224 = vmatpush.msra.mxu0 %v825_v16  ;;  %303 = vmatpush.msra.mxu2 %v825_v16 }
  0x1f   : > { %381 = vmatpush.msrb.mxu1 %v776_v8  ;;  %669 = vmatpush.msra.mxu3 %v736_v3 }
  0x20   : > { %225 = vmatpush.msra.mxu0 %v833_v17  ;;  %304 = vmatpush.msra.mxu2 %v833_v17 }
  0x21   : > { %382 = vmatpush.msrb.mxu1 %v786_v10  ;;  %670 = vmatpush.msra.mxu3 %v754_v5 }
  0x22   : > { %226 = vmatpush.msra.mxu0 %v844_v18  ;;  %305 = vmatpush.msra.mxu2 %v844_v18 }
  0x23   : > { %620 = vmatmul.msk.f32.gmra.mxu3 %vm198_vm1, %v614_v19  ;;  %383 = vmatpush.msrb.mxu1 %v794_v11  ;;  %v679_v19 = vld [vmem:[%s988_s2] ss:$0 sm:$0xff] }
  0x24   : > { %227 = vmatpush.msra.mxu0 %v854_v20  ;;  %306 = vmatpush.msra.mxu2 %v854_v20 }
  0x25   : > { %384 = vmatpush.msrb.mxu1 %v804_v12 }
  0x26   : > { %228 = vmatpush.msra.mxu0 %v864_v21  ;;  %307 = vmatpush.msra.mxu2 %v864_v21 }
  0x27   : > { %607 = vmatmul.msk.f32.gmra.mxu1 %vm198_vm1, %v195_v22 }
  0x28   : > { %229 = vmatpush.msra.mxu0 %v873_v23  ;;  %308 = vmatpush.msra.mxu2 %v873_v23 }
  0x29   : > { %385 = vmatpush.msrb.mxu1 %v814_v14 }
  0x2a   : > { %230 = vmatpush.msra.mxu0 %v881_v24  ;;  %309 = vmatpush.msra.mxu2 %v881_v24 }
  0x2b   : > { %621 = vmatmul.msk.f32.gmra.mxu3 %vm198_vm1, %v616_v25  ;;  %231 = vmatmul.f32.vlgmr.msra.gmra.mxu0 %v190_v26 }
  0x2c   : > { %310 = vmatmul.f32.vlgmr.msra.gmra.mxu2 %v609_v27  ;;  %386 = vmatpush.msrb.mxu1 %v825_v16 }
  0x2d   : > { %643 = vmatpush.msk.msrb.mxu2 %vm211_vm0, %v724_v1  ;;  %460 = vmatpush.msrb.mxu0 %v719_v0 }
  0x2e   : > { %387 = vmatpush.msrb.mxu1 %v833_v17 }
  0x2f   : > { %608 = vmatmul.msk.f32.gmra.mxu1 %vm198_vm1, %v197_v28  ;;  %461 = vmatpush.msrb.mxu0 %v729_v2 }
  0x30   : > { %388 = vmatpush.msrb.mxu1 %v844_v18  ;;  %503 = vmatpush.msrb.mxu2 %v736_v3 }
  0x31   : > { %462 = vmatpush.msrb.mxu0 %v743_v4 }
  0x32   : > { %389 = vmatpush.msrb.mxu1 %v854_v20  ;;  %504 = vmatpush.msrb.mxu2 %v754_v5 }
  0x33   : > { %631 = vmatmul.msk.f32.vlgmr.msrb.gmra.mxu3 %vm198_vm1, %v623_v29  ;;  %234 = vmatmul.f32.gmra.mxu0 %v192_v30 }
  0x34   : > { %313 = vmatmul.f32.gmra.mxu2 %v611_v31  ;;  %390 = vmatpush.msrb.mxu1 %v864_v21 }
  0x35   : > { %463 = vmatpush.msrb.mxu0 %v760_v6 }
  0x36   : > { %391 = vmatpush.msrb.mxu1 %v873_v23 }
  0x37   : > { %464 = vmatpush.msrb.mxu0 %v776_v8 }
  0x38   : > { %392 = vmatpush.msrb.mxu1 %v881_v24 }
  0x39   : > { %393 = vmatmul.f32.vlgmr.msrb.gmra.mxu1 %v622_v32  ;;  %465 = vmatpush.msrb.mxu0 %v786_v10 }
  0x3a   : > { %652 = vmatpush.msra.mxu1 %v719_v0 }
  0x3b   : > { %632 = vmatmul.msk.f32.gmra.mxu3 %vm198_vm1, %v625_v33  ;;  %237 = vmatmul.f32.gmra.mxu0 %v194_v34 }
  0x3c   : > { %316 = vmatmul.f32.gmra.mxu2 %v613_v35  ;;  %653 = vmatpush.msra.mxu1 %v729_v2 }
  0x3d   : > { %466 = vmatpush.msrb.mxu0 %v794_v11 }
  0x3e   : > { %654 = vmatpush.msra.mxu1 %v743_v4 }
  0x3f   : > { %467 = vmatpush.msrb.mxu0 %v804_v12 }
  0x40   : > { %655 = vmatpush.msra.mxu1 %v760_v6 }
  0x41   : > { %396 = vmatmul.f32.gmra.mxu1 %v624_v36  ;;  %468 = vmatpush.msrb.mxu0 %v814_v14 }
  0x42   : > { %656 = vmatpush.msra.mxu1 %v776_v8 }
  0x43   : > { %633 = vmatmul.msk.f32.gmra.mxu3 %vm198_vm1, %v627_v37  ;;  %240 = vmatmul.f32.gmra.mxu0 %v196_v38 }
  0x44   : > { %319 = vmatmul.f32.gmra.mxu2 %v615_v39  ;;  %657 = vmatpush.msra.mxu1 %v786_v10 }
  0x45   : > { %469 = vmatpush.msrb.mxu0 %v825_v16 }
  0x46   : > { %658 = vmatpush.msra.mxu1 %v794_v11 }
  0x47   : > { %470 = vmatpush.msrb.mxu0 %v833_v17 }
  0x48   : > { %659 = vmatpush.msra.mxu1 %v804_v12 }
  0x49   : > { %471 = vmatpush.msrb.mxu0 %v844_v18  ;;  %399 = vmatmul.f32.gmra.mxu1 %v626_v40 }
  0x4a   : > { %660 = vmatpush.msra.mxu1 %v814_v14 }
  0x4b   : > { %472 = vmatpush.msrb.mxu0 %v854_v20  ;;  %634 = vmatmul.msk.f32.gmra.mxu3 %vm198_vm1, %v629_v41 }
  0x4c   : > { %661 = vmatpush.msra.mxu1 %v825_v16  ;;  %644 = vmatmul.msk.f32.vlgmr.msrb.gmra.mxu2 %vm198_vm1, %v636_v42 }
  0x4d   : > { %473 = vmatpush.msrb.mxu0 %v864_v21 }
  0x4e   : > { %662 = vmatpush.msra.mxu1 %v833_v17 }
  0x4f   : > { %474 = vmatpush.msrb.mxu0 %v873_v23 }
  0x50   : > { %663 = vmatpush.msra.mxu1 %v844_v18 }
  0x51   : > { %475 = vmatpush.msrb.mxu0 %v881_v24  ;;  %402 = vmatmul.f32.gmra.mxu1 %v628_v43 }
  0x52   : > { %664 = vmatpush.msra.mxu1 %v854_v20  ;;  %476 = vmatmul.f32.vlgmr.msrb.gmra.mxu0 %v635_v44 }
  0x53   : > { %647 = vmatmul.msk.f32.vlgmr.msra.gmra.mxu3 %vm198_vm1, %v642_v45 }
  0x54   : > { %665 = vmatpush.msra.mxu1 %v864_v21  ;;  %645 = vmatmul.msk.f32.gmra.mxu2 %vm198_vm1, %v638_v46 }
  0x56   : > { %666 = vmatpush.msra.mxu1 %v873_v23 }
  0x58   : > { %667 = vmatpush.msra.mxu1 %v881_v24 }
  0x59   : > { %485 = vmatmul.f32.vlgmr.msra.gmra.mxu1 %v641_v47 }
  0x5a   : > { %479 = vmatmul.f32.gmra.mxu0 %v637_v48 }
  0x5c   : > { %646 = vmatmul.msk.f32.gmra.mxu2 %vm198_vm1, %v640_v49 }
  0x62   : > { %482 = vmatmul.f32.gmra.mxu0 %v639_v50 }
  0x90   : > { %v261_v51 = vpop.f32.mrf.mxu1 }
  0x96   : > { %v340_v52 = vpop.f32.mrf.mxu3 }
  0x9a   : > { %v264_v53 = vpop.f32.mrf.mxu1 }
  0x9e   : > { %v343_v54 = vpop.f32.mrf.mxu3 }
  0xa4   : > { %v267_v55 = vpop.f32.mrf.mxu1 }
  0xa6   : > { %v346_v56 = vpop.f32.mrf.mxu3 }
  0xa8   : > { %v232_v57 = vpop.f32.mrf.mxu0 }
  0xa9   : > { %v262_v10 = vadd.f32 %v261_v51, %v232_v57 }
  0xac   : > { %v270_v58 = vpop.f32.mrf.mxu1 }
  0xae   : > { %v349_v59 = vpop.f32.mrf.mxu3 }
  0xaf   : > { %v311_v60 = vpop.f32.mrf.mxu2 }
  0xb0   : > { %v235_v61 = vpop.f32.mrf.mxu0  ;;  %v341_v9 = vadd.f32 %v340_v52, %v311_v60 }
  0xb1   : > { %v265_v25 = vadd.f32 %v264_v53, %v235_v61 }
  0xb2   : > { %v352_v12 = vmax.f32 %v262_v10, %v341_v9 }
  0xb6   : > { %v394_v62 = vpop.f32.mrf.mxu1  ;;  %v423_v63 = vpop.f32.mrf.mxu3 }
  0xb7   : > { %v314_v0 = vpop.f32.mrf.mxu2  ;;  %v424_v11 = vadd.f32 %v423_v63, %v394_v62 }
  0xb8   : > { %v238_v1 = vpop.f32.mrf.mxu0  ;;  %v344_v21 = vadd.f32 %v343_v54, %v314_v0 }
  0xb9   : > { %v435_v17 = vmax.f32 %v352_v12, %v424_v11  ;;  %v268_v43 = vadd.f32 %v267_v55, %v238_v1 }
  0xba   : > { %v353_v29 = vmax.f32 %v265_v25, %v344_v21 }
  0xbe   : > { %v397_v2 = vpop.f32.mrf.mxu1  ;;  %v426_v3 = vpop.f32.mrf.mxu3 }
  0xbf   : > { %v317_v4 = vpop.f32.mrf.mxu2  ;;  %v427_v26 = vadd.f32 %v426_v3, %v397_v2 }
  0xc0   : > { %v241_v7 = vpop.f32.mrf.mxu0  ;;  %v347_v40 = vadd.f32 %v346_v56, %v317_v4 }
  0xc1   : > { %v271_v23 = vadd.f32 %v270_v58, %v241_v7  ;;  %v436_v37 = vmax.f32 %v353_v29, %v427_v26 }
  0xc2   : > { %v354_v47 = vmax.f32 %v268_v43, %v347_v40 }
  0xc6   : > { %v400_v5 = vpop.f32.mrf.mxu1  ;;  %v429_v6 = vpop.f32.mrf.mxu3 }
  0xc7   : > { %v320_v8 = vpop.f32.mrf.mxu2  ;;  %v430_v44 = vadd.f32 %v429_v6, %v400_v5 }
  0xc8   : > { %v350_v20 = vadd.f32 %v349_v59, %v320_v8 }
  0xc9   : > { %v437_v51 = vmax.f32 %v354_v47, %v430_v44 }
  0xca   : > { %v355_v28 = vmax.f32 %v271_v23, %v350_v20 }
  0xce   : > { %v403_v13 = vpop.f32.mrf.mxu1  ;;  %v432_v14 = vpop.f32.mrf.mxu3 }
  0xcf   : > { %v477_v15 = vpop.f32.mrf.mxu0  ;;  %v506_v16 = vpop.f32.mrf.mxu2  ;;  %v433_v24 = vadd.f32 %v432_v14, %v403_v13 }
  0xd0   : > { %v507_v18 = vadd.f32 %v506_v16, %v477_v15 }
  0xd1   : > { %v438_v33 = vmax.f32 %v355_v28, %v433_v24 }
  0xd2   : > { %v518_v22 = vmax.f32 %v435_v17, %v507_v18 }
  0xd4   : > { %v526_v27 = vadd.f32 %v679_v19, %v518_v22 }
  0xd6   : > { %v530_v30 = vmax.f32 %v526_v27, 0.0  ;;  %v486_v31 = vpop.f32.mrf.mxu1  ;;  %v515_v32 = vpop.f32.mrf.mxu3 }
  0xd7   : > { %v516_v34 = vadd.f32 %v515_v32, %v486_v31  ;;  %v480_v35 = vpop.f32.mrf.mxu0  ;;  %v509_v36 = vpop.f32.mrf.mxu2 }
  0xd8   : > { %535 = vst.msk [vmem:[%s974_s9] sm:$0xff] %vm534_vm2, %v530_v30  ;;  %v510_v38 = vadd.f32 %v509_v36, %v480_v35 }
  0xd9   : > { %v521_v39 = vmax.f32 %v438_v33, %v516_v34 }
  0xda   : > { %v519_v41 = vmax.f32 %v436_v37, %v510_v38 }
  0xdb   : > { %v529_v42 = vadd.f32 %v679_v19, %v521_v39 }
  0xdc   : > { %v527_v45 = vadd.f32 %v679_v19, %v519_v41 }
  0xdd   : > { %v533_v46 = vmax.f32 %v529_v42, 0.0 }
  0xde   : > { %v531_v48 = vmax.f32 %v527_v45, 0.0 }
  0xdf   : > { %539 = vst.msk [vmem:[%s974_s9 + $0x18] sm:$0x1] %vm538_vm3, %v533_v46  ;;  %v483_v49 = vpop.f32.mrf.mxu0  ;;  %v512_v50 = vpop.f32.mrf.mxu2 }
  0xe0   : > { %536 = vst.msk [vmem:[%s974_s9 + $0x8] sm:$0xff] %vm534_vm2, %v531_v48  ;;  %v513_v52 = vadd.f32 %v512_v50, %v483_v49 }
  0xe2   : > { %v520_v53 = vmax.f32 %v437_v51, %v513_v52 }
  0xe4   : > { %v528_v54 = vadd.f32 %v679_v19, %v520_v53 }
  0xe6   : > { %v532_v56 = vmax.f32 %v528_v54, 0.0 }
  0xe8   : > { %537 = vst.msk [vmem:[%s974_s9 + $0x10] sm:$0xff] %vm534_vm2, %v532_v56 }
  0xe9 PF: > { %s13_s12 = sadd.s32 1, %s686_s12  }
  0xea   : > { %p10_p4 = scmp.ge.s32.totalorder %s13_s12, 4  }
  0xec   :  { %12 = sbr.rel (!%p10_p4) target bundleno = 1 (0x1), region = 65 }

// kernel: lenet5_forward.5
= control target key start
LH: loop header
LB: loop body
LE: loop exit
PB: predicated region body
PF: predicated region fallthrough
CT: control target
= control target key end

     0   :  { %s629_s0 = inlined_call_operand.vmem [shape: f32[2,400], index: 0, kind: input, shape index: {}]   ;;  %s630_s1 = inlined_call_operand.vmem [shape: f32[400,120], index: 1, kind: input, shape index: {}]   ;;  %s631_s2 = inlined_call_operand.vmem [shape: f32[1,120], index: 2, kind: input, shape index: {}]   ;;  %s632_s3 = inlined_call_operand.vmem [shape: f32[120,84], index: 3, kind: input, shape index: {}]   ;;  %s633_s4 = inlined_call_operand.vmem [shape: f32[1,84], index: 4, kind: input, shape index: {}]   ;;  %s634_s5 = inlined_call_operand.vmem [shape: f32[84,10], index: 5, kind: input, shape index: {}]   ;;  %s635_s6 = inlined_call_operand.vmem [shape: f32[1,10], index: 6, kind: input, shape index: {}]   ;;  %s636_s7 = inlined_call_operand.hbm [shape: f32[2,10], index: 7, kind: output, shape index: {}]  }
   0x1   :  { %v75_v0 = vld [vmem:[%s630_s1 + $0x178] sm:$0xff]  ;;  %v74_v2 = vld [vmem:[%s630_s1 + $0x170] sm:$0xff]  ;;  %v73_v5 = vld [vmem:[%s630_s1 + $0x168] sm:$0xff] }
   0x2   :  { %v43_v1 = vld [vmem:[%s630_s1 + $0x78] sm:$0xff]  ;;  %134 = vmatpush.msra.mxu2 %v75_v0  ;;  %v42_v3 = vld [vmem:[%s630_s1 + $0x70] sm:$0xff]  ;;  %v41_v6 = vld [vmem:[%s630_s1 + $0x68] sm:$0xff] }
   0x3   :  { %94 = vmatpush.msra.mxu0 %v43_v1  ;;  %v59_v4 = vld [vmem:[%s630_s1 + $0xf8] sm:$0xff]  ;;  %v58_v7 = vld [vmem:[%s630_s1 + $0xf0] sm:$0xff]  ;;  %v57_v8 = vld [vmem:[%s630_s1 + $0xe8] sm:$0xff] }
   0x4   :  { %114 = vmatpush.msra.mxu1 %v59_v4  ;;  %135 = vmatpush.msra.mxu2 %v74_v2  ;;  %v72_v9 = vld [vmem:[%s630_s1 + $0x160] sm:$0xff]  ;;  %v71_v12 = vld [vmem:[%s630_s1 + $0x158] sm:$0xff]  ;;  %v70_v15 = vld [vmem:[%s630_s1 + $0x150] sm:$0xff] }
   0x5   :  { %95 = vmatpush.msra.mxu0 %v42_v3  ;;  %v40_v10 = vld [vmem:[%s630_s1 + $0x60] sm:$0xff]  ;;  %v39_v13 = vld [vmem:[%s630_s1 + $0x58] sm:$0xff]  ;;  %v38_v16 = vld [vmem:[%s630_s1 + $0x50] sm:$0xff] }
   0x6   :  { %115 = vmatpush.msra.mxu1 %v58_v7  ;;  %136 = vmatpush.msra.mxu2 %v73_v5  ;;  %v56_v11 = vld [vmem:[%s630_s1 + $0xe0] sm:$0xff]  ;;  %v55_v14 = vld [vmem:[%s630_s1 + $0xd8] sm:$0xff]  ;;  %v54_v17 = vld [vmem:[%s630_s1 + $0xd0] sm:$0xff] }
   0x7   :  { %96 = vmatpush.msra.mxu0 %v41_v6  ;;  %v69_v18 = vld [vmem:[%s630_s1 + $0x148] sm:$0xff]  ;;  %v68_v21 = vld [vmem:[%s630_s1 + $0x140] sm:$0xff]  ;;  %v67_v24 = vld [vmem:[%s630_s1 + $0x138] sm:$0xff] }
   0x8   :  { %116 = vmatpush.msra.mxu1 %v57_v8  ;;  %137 = vmatpush.msra.mxu2 %v72_v9  ;;  %v37_v19 = vld [vmem:[%s630_s1 + $0x48] sm:$0xff]  ;;  %v36_v22 = vld [vmem:[%s630_s1 + $0x40] sm:$0xff]  ;;  %v35_v25 = vld [vmem:[%s630_s1 + $0x38] sm:$0xff] }
   0x9   :  { %97 = vmatpush.msra.mxu0 %v40_v10  ;;  %v53_v20 = vld [vmem:[%s630_s1 + $0xc8] sm:$0xff]  ;;  %v52_v23 = vld [vmem:[%s630_s1 + $0xc0] sm:$0xff]  ;;  %v51_v26 = vld [vmem:[%s630_s1 + $0xb8] sm:$0xff] }
   0xa   :  { %117 = vmatpush.msra.mxu1 %v56_v11  ;;  %138 = vmatpush.msra.mxu2 %v71_v12  ;;  %v77_v27 = vld [vmem:[%s630_s1 + $0x188] sm:$0xff]  ;;  %v27_v28 = vld [vmem:[%s629_s0] sm:$0xff]  ;;  %v66_v29 = vld [vmem:[%s630_s1 + $0x130] sm:$0xff] }
   0xb   :  { %98 = vmatpush.msra.mxu0 %v39_v13  ;;  %v34_v30 = vld [vmem:[%s630_s1 + $0x30] sm:$0xff]  ;;  %168 = vmatpush.msra.mxu3 %v77_v27  ;;  %83 = vst [vmem:[#allocation1] ss:$4 sm:$0xff] %v27_v28  ;;  %v76_v31 = vld [vmem:[%s630_s1 + $0x180] sm:$0xff]  ;;  %v65_v34 = vld [vmem:[%s630_s1 + $0x128] sm:$0xff] }
   0xc   :  { %118 = vmatpush.msra.mxu1 %v55_v14  ;;  %139 = vmatpush.msra.mxu2 %v70_v15  ;;  %v50_v32 = vld [vmem:[%s630_s1 + $0xb0] sm:$0xff]  ;;  %v33_v35 = vld [vmem:[%s630_s1 + $0x28] sm:$0xff]  ;;  %v64_v36 = vld [vmem:[%s630_s1 + $0x120] sm:$0xff] }
   0xd   :  { %99 = vmatpush.msra.mxu0 %v38_v16  ;;  %v189_v33 = vld [vmem:[%s632_s3 + $0x70] sm:$0xff]  ;;  %169 = vmatpush.msra.mxu3 %v76_v31  ;;  %v32_v37 = vld [vmem:[%s630_s1 + $0x20] sm:$0xff]  ;;  %v49_v38 = vld [vmem:[%s630_s1 + $0xa8] sm:$0xff] }
   0xe   :  { %119 = vmatpush.msra.mxu1 %v54_v17  ;;  %140 = vmatpush.msra.mxu2 %v69_v18  ;;  %v188_v39 = vld [vmem:[%s632_s3 + $0x68] sm:$0xff]  ;;  %v48_v40 = vld [vmem:[%s630_s1 + $0xa0] sm:$0xff] }
   0xf   :  { %100 = vmatpush.msra.mxu0 %v37_v19  ;;  %199 = vmatpush.msrb.mxu3 %v189_v33  ;;  %v187_v41 = vld [vmem:[%s632_s3 + $0x60] sm:$0xff] }
  0x10   :  { %120 = vmatpush.msra.mxu1 %v53_v20  ;;  %141 = vmatpush.msra.mxu2 %v68_v21 }
  0x11   :  { %101 = vmatpush.msra.mxu0 %v36_v22 }
  0x12   :  { %121 = vmatpush.msra.mxu1 %v52_v23  ;;  %142 = vmatpush.msra.mxu2 %v67_v24 }
  0x13   :  { %102 = vmatpush.msra.mxu0 %v35_v25 }
  0x14   :  { %122 = vmatpush.msra.mxu1 %v51_v26  ;;  %143 = vmatpush.msra.mxu2 %v66_v29 }
  0x15   :  { %103 = vmatpush.msra.mxu0 %v34_v30 }
  0x16   :  { %123 = vmatpush.msra.mxu1 %v50_v32  ;;  %144 = vmatpush.msra.mxu2 %v65_v34 }
  0x17   :  { %104 = vmatpush.msra.mxu0 %v33_v35 }
  0x18   :  { %12 = vsyncpa [#allocation3], 0  ;;  %124 = vmatpush.msra.mxu1 %v49_v38  ;;  %v63_v42 = vld [vmem:[%s630_s1 + $0x118] sm:$0xff]  ;;  %200 = vmatpush.msrb.mxu3 %v188_v39  ;;  %vm91_vm0 = vcmask 130048   ;;  %v62_v45 = vld [vmem:[%s630_s1 + $0x110] sm:$0xff]  ;;  %vm238_vm1 = vcmask 1043456  }
  0x19   :  { %v31_v43 = vld [vmem:[%s630_s1 + $0x18] sm:$0xff]  ;;  %145 = vmatpush.msra.mxu2 %v64_v36  ;;  %105 = vmatpush.msra.mxu0 %v32_v37  ;;  %v30_v46 = vld [vmem:[%s630_s1 + $0x10] sm:$0xff]  ;;  %v61_v50 = vld [vmem:[%s630_s1 + $0x108] sm:$0xff]  ;;  %vm194_vm2 = vcmask 982016   ;;  %vm234_vm3 = vcmask 687104   ;;  %vm262_vm4 = vcmask 74752  }
  0x1a   :  { %v47_v44 = vld [vmem:[%s630_s1 + $0x98] sm:$0xff]  ;;  %125 = vmatpush.msra.mxu1 %v48_v40  ;;  %201 = vmatpush.msrb.mxu3 %v187_v41  ;;  %v46_v48 = vld [vmem:[%s630_s1 + $0x90] sm:$0xff]  ;;  %v29_v51 = vld [vmem:[%s630_s1 + $0x8] sm:$0xff]  ;;  %s295_s16 = sshll.u32 %s636_s7, 4  ;;  %s296_s16 = int_to_ptr.hbm [resolvable:$true] %s295_s16 }
  0x1b   :  { %v87_v47 = vld.sshfl [vmem:[#allocation1 + $0x18] sm:$0xff pattern:$0x73625140]  ;;  %146 = vmatpush.msra.mxu2 %v63_v42  ;;  %106 = vmatpush.msra.mxu0 %v31_v43  ;;  %v45_v52 = vld [vmem:[%s630_s1 + $0x88] sm:$0xff]  ;;  %v185_v53 = vld [vmem:[%s632_s3 + $0x50] sm:$0xff] }
  0x1c   :  { %v186_v49 = vld [vmem:[%s632_s3 + $0x58] sm:$0xff]  ;;  %126 = vmatpush.msra.mxu1 %v47_v44  ;;  %304 = vmatmul.msk.f32.vlgmr.msra.gmra.mxu3 %vm91_vm0, %v87_v47  ;;  %v60_v54 = vld [vmem:[%s630_s1 + $0x100] sm:$0xff]  ;;  %v86_v56 = vld.sshfl [vmem:[#allocation1 + $0x10] sm:$0xff pattern:$0x73625140] }
  0x1d   :  { %147 = vmatpush.msra.mxu2 %v62_v45  ;;  %107 = vmatpush.msra.mxu0 %v30_v46  ;;  %v28_v55 = vld [vmem:[%s630_s1] sm:$0xff]  ;;  %v184_v59 = vld [vmem:[%s632_s3 + $0x48] sm:$0xff]  ;;  %v182_v62 = vld [vmem:[%s632_s3 + $0x38] sm:$0xff] }
  0x1e   :  { %127 = vmatpush.msra.mxu1 %v46_v48  ;;  %202 = vmatpush.msrb.mxu3 %v186_v49  ;;  %v84_v57 = vld.sshfl [vmem:[#allocation1] sm:$0xff pattern:$0x73625140]  ;;  %v85_v60 = vld.sshfl [vmem:[#allocation1 + $0x8] sm:$0xff pattern:$0x73625140] }
  0x1f   :  { %148 = vmatpush.msra.mxu2 %v61_v50  ;;  %108 = vmatpush.msra.mxu0 %v29_v51  ;;  %v44_v58 = vld [vmem:[%s630_s1 + $0x80] sm:$0xff]  ;;  %v181_v63 = vld [vmem:[%s632_s3 + $0x30] sm:$0xff]  ;;  %v180_v0 = vld [vmem:[%s632_s3 + $0x28] sm:$0xff] }
  0x20   :  { %128 = vmatpush.msra.mxu1 %v45_v52  ;;  %203 = vmatpush.msrb.mxu3 %v185_v53  ;;  %v183_v61 = vld [vmem:[%s632_s3 + $0x40] sm:$0xff]  ;;  %v178_v2 = vld [vmem:[%s632_s3 + $0x18] sm:$0xff]  ;;  %v177_v3 = vld [vmem:[%s632_s3 + $0x10] sm:$0xff] }
  0x21   :  { %149 = vmatpush.msra.mxu2 %v60_v54  ;;  %109 = vmatpush.msra.mxu0 %v28_v55  ;;  %v179_v1 = vld [vmem:[%s632_s3 + $0x20] sm:$0xff]  ;;  %v176_v4 = vld [vmem:[%s632_s3 + $0x8] sm:$0xff]  ;;  %v229_v6 = vld [vmem:[%s634_s5 + $0x50] sm:$0xf] }
  0x22   :  { %150 = vmatmul.f32.vlgmr.msra.gmra.mxu2 %v86_v56  ;;  %110 = vmatmul.f32.vlgmr.msra.gmra.mxu0 %v84_v57  ;;  %v175_v5 = vld [vmem:[%s632_s3] sm:$0xff]  ;;  %v228_v7 = vld [vmem:[%s634_s5 + $0x48] sm:$0xff]  ;;  %v226_v9 = vld [vmem:[%s634_s5 + $0x38] sm:$0xff] }
  0x23   :  { %129 = vmatpush.msra.mxu1 %v44_v58  ;;  %204 = vmatpush.msrb.mxu3 %v184_v59  ;;  %v227_v8 = vld [vmem:[%s634_s5 + $0x40] sm:$0xff]  ;;  %v225_v10 = vld [vmem:[%s634_s5 + $0x30] sm:$0xff]  ;;  %v224_v11 = vld [vmem:[%s634_s5 + $0x28] sm:$0xff] }
  0x24   :  { %130 = vmatmul.f32.vlgmr.msra.gmra.mxu1 %v85_v60  ;;  %306 = vmatpush.msk.msrb.mxu0 %vm238_vm1, %v229_v6  ;;  %v223_v12 = vld [vmem:[%s634_s5 + $0x20] sm:$0xff]  ;;  %v222_v13 = vld [vmem:[%s634_s5 + $0x18] sm:$0xff]  ;;  %v221_v24 = vld [vmem:[%s634_s5 + $0x10] sm:$0xff] }
  0x25   :  { %205 = vmatpush.msrb.mxu3 %v183_v61  ;;  %v309_v14 = vld [vmem:[%s631_s2] ss:$0 sm:$0xff]  ;;  %v220_v25 = vld [vmem:[%s634_s5 + $0x8] sm:$0xff] }
  0x26   :  { %248 = vmatpush.msrb.mxu0 %v228_v7  ;;  %v219_v26 = vld [vmem:[%s634_s5] sm:$0xff] }
  0x27   :  { %206 = vmatpush.msrb.mxu3 %v182_v62  ;;  %v310_v27 = vld [vmem:[%s633_s4] ss:$0 sm:$0xff]  ;;  %s342_s4 = smov [#allocation2]  }
  0x28   :  { %249 = vmatpush.msrb.mxu0 %v227_v8  ;;  %v311_v31 = vld [vmem:[%s635_s6] ss:$0 sm:$0xff]  ;;  %s293_s5 = sshll.u32 %s342_s4, 4  ;;  %s294_s5 = int_to_ptr.vmem [resolvable:$true] %s293_s5 }
  0x29   :  { %207 = vmatpush.msrb.mxu3 %v181_v63 }
  0x2a   :  { %250 = vmatpush.msrb.mxu0 %v226_v9 }
  0x2b   :  { %208 = vmatpush.msrb.mxu3 %v180_v0 }
  0x2c   :  { %251 = vmatpush.msrb.mxu0 %v225_v10 }
  0x2d   :  { %209 = vmatpush.msrb.mxu3 %v179_v1 }
  0x2e   :  { %252 = vmatpush.msrb.mxu0 %v224_v11 }
  0x2f   :  { %210 = vmatpush.msrb.mxu3 %v178_v2 }
  0x30   :  { %253 = vmatpush.msrb.mxu0 %v223_v12 }
  0x31   :  { %211 = vmatpush.msrb.mxu3 %v177_v3 }
  0x32   :  { %254 = vmatpush.msrb.mxu0 %v222_v13 }
  0x33   :  { %212 = vmatpush.msrb.mxu3 %v176_v4 }
  0x34   :  { %255 = vmatpush.msrb.mxu0 %v221_v24 }
  0x35   :  { %213 = vmatpush.msrb.mxu3 %v175_v5 }
  0x36   :  { %256 = vmatpush.msrb.mxu0 %v220_v25 }
  0x38   :  { %257 = vmatpush.msrb.mxu0 %v219_v26 }
  0x9f   :  { %v111_v15 = vpop.f32.mrf.mxu0  ;;  %v171_v20 = vpop.f32.mrf.mxu3 }
  0xa0   :  { %v112_v16 = vadd.f32 %v309_v14, %v111_v15 }
  0xa1   :  { %v131_v17 = vpop.f32.mrf.mxu1 }
  0xa2   :  { %v132_v18 = vadd.f32 %v131_v17, %v112_v16 }
  0xa5   :  { %v151_v19 = vpop.f32.mrf.mxu2 }
  0xa6   :  { %v152_v21 = vadd.f32 %v151_v19, %v132_v18 }
  0xa8   :  { %v172_v22 = vadd.f32 %v171_v20, %v152_v21 }
  0xaa   :  { %v174_v23 = vmax.f32 %v172_v22, 0.0 }
  0xac   :  { %305 = vmatmul.msk.f32.vlgmr.msrb.gmra.mxu3 %vm194_vm2, %v174_v23 }
 0x12f   :  { %v215_v28 = vpop.f32.mrf.mxu3 }
 0x130   :  { %v216_v29 = vadd.f32 %v310_v27, %v215_v28 }
 0x132   :  { %v218_v30 = vmax.f32 %v216_v29, 0.0 }
 0x134   :  { %307 = vmatmul.msk.f32.vlgmr.msrb.gmra.mxu0 %vm234_vm3, %v218_v30 }
 0x1b1   :  { %v259_v32 = vpop.f32.mrf.mxu0 }
 0x1b2   :  { %v260_v33 = vadd.f32 %v311_v31, %v259_v32 }
 0x1b4   :  { %v263_v34 = vsel %vm262_vm4, %v260_v33, -inf }
 0x1b5   :  { %264 = vmax.xlane.f32.xlu0 %v263_v34 }
 0x228   :  { %v265_v35 = vpop.xlane.xlu0 %264 }
 0x229   :  { %v266_v36 = vsub.f32 %v260_v33, %v265_v35 }
 0x22b   :  { %v267_v37 = vmul.f32 1.442695, %v266_v36 }
 0x22d   :  { %312 = vpow2.f32 %v267_v37 }
 0x233   :  { %v313_v38 = vpop.eup %312 }
 0x234   :  { %v269_v39 = vsel %vm262_vm4, %v313_v38, 0.0 }
 0x235   :  { %270 = vadd.xlane.f32.xlu0 %v269_v39 }
 0x2a8   :  { %v271_v40 = vpop.xlane.xlu0 %270 }
 0x2a9   :  { %314 = vrcp.f32 %v271_v40  ;;  %v283_v44 = vand.u32 2147483648, %v271_v40  ;;  %v281_v46 = vand.u32 2147483647, %v271_v40  ;;  %vm277_vm6 = vweird.f32 %v271_v40 }
 0x2ab   :  { %v284_v48 = vor.u32 1.1754944e-38, %v283_v44  ;;  %vm282_vm8 = vcmp.eq.f32.partialorder %v281_v46, 8.507059e+37 }
 0x2af   :  { %v315_v41 = vpop.eup %314 }
 0x2b0   :  { %v273_v42 = vmul.f32 %v315_v41, %v271_v40  ;;  %vm278_vm5 = vweird.f32 %v315_v41 }
 0x2b1   :  { %vm279_vm7 = vmor %vm277_vm6, %vm278_vm5 }
 0x2b2   :  { %v274_v43 = vsub.f32 1.0, %v273_v42 }
 0x2b4   :  { %v275_v45 = vmul.f32 %v315_v41, %v274_v43 }
 0x2b6   :  { %v276_v47 = vadd.f32 %v315_v41, %v275_v45 }
 0x2b8   :  { %v280_v49 = vsel %vm279_vm7, %v315_v41, %v276_v47 }
 0x2b9   :  { %v285_v50 = vsel %vm282_vm8, %v284_v48, %v280_v49 }
 0x2ba   :  { %v286_v51 = vmul.f32 %v313_v38, %v285_v50 }
 0x2bc   :  { %287 = vst.msk [vmem:[#allocation2] sm:$0x3] %vm262_vm4, %v286_v51 }
 0x2bd   :  { %298 = dma.vmem_to_hbm [thread:$0]  %s294_s5, 32, %s296_s16, [#allocation3]  }
 0x2be   :  { %340 = dma.done.wait [#allocation3], 32  }
 0x2bf   :  { %341 = vsyncadd [#allocation3], 4294967264 }
 0x2c0   :  { %303 = vsyncpa [#allocation3], 1 }

</bundles_post_ra>
